<compile_context>
chip_gen: v6e
topology: v6e:2x2x1
jax: 0.10.0
libtpu: 0.0.40
codegen_flags: <defaults>
</compile_context>

<pallas_src>
import functools

import jax
import jax.numpy as jnp
from jax.experimental import pallas as pl
from jax.experimental.pallas import tpu as pltpu


# ----------------------------------------------------------------------------
# Transposed-GEMM conv kernel:  out[N, M] = act( W[N, K] @ P[K, M] + b[N, 1] )
# ----------------------------------------------------------------------------
def _convT_kernel(w_ref, p_ref, b_ref, o_ref, *, act):
    acc = jnp.dot(w_ref[...], p_ref[...], preferred_element_type=jnp.float32)
    y = acc + b_ref[...]                       # (N, tm) + (N, 1) lane-broadcast
    if act == "leaky_relu":
        y = jnp.where(y > 0, y, 0.2 * y)
    elif act == "sigmoid":
        y = jax.nn.sigmoid(y)
    o_ref[...] = y.astype(o_ref.dtype)


def fused_convT(w_bf16, patches_bf16, bias_col, act, tile_m=1024):
    """Lane-dense fused conv matmul.  w:(N,K) bf16, patches:(K,M) bf16, bias:(N,1) f32."""
    N, K = w_bf16.shape
    K2, M = patches_bf16.shape
    assert K == K2
    # Full-extent M block for small layers (single grid step on single-TC chips);
    # 1024-lane blocks for enc1 (M=2048) so the 2-step grid can shard across the
    # two v7x TensorCores via "parallel" dimension semantics.
    tm = M if M <= tile_m else tile_m
    grid = (pl.cdiv(M, tm),)

    cost = pl.CostEstimate(
        flops=2 * M * K * N,
        transcendentals=(M * N if act == "sigmoid" else 0),
        bytes_accessed=int(2 * w_bf16.size + 2 * patches_bf16.size + 4 * N + 2 * M * N),
    )
    kernel = functools.partial(_convT_kernel, act=act)
    return pl.pallas_call(
        kernel,
        out_shape=jax.ShapeDtypeStruct((N, M), jnp.bfloat16),
        grid_spec=pltpu.PrefetchScalarGridSpec(
            num_scalar_prefetch=0,
            grid=grid,
            in_specs=[
                pl.BlockSpec((N, K), lambda i: (0, 0)),    # folded weights (resident)
                pl.BlockSpec((K, tm), lambda i: (0, i)),   # patch slab tile (lane-dense M)
                pl.BlockSpec((N, 1), lambda i: (0, 0)),    # folded per-channel bias
            ],
            out_specs=pl.BlockSpec((N, tm), lambda i: (0, i)),
        ),
        compiler_params=pltpu.CompilerParams(
            dimension_semantics=("parallel",),
            vmem_limit_bytes=16 * 1024 * 1024,
        ),
        cost_estimate=cost,
    )(w_bf16, patches_bf16, bias_col)


# ----------------------------------------------------------------------------
# Fused heads kernel: sen_match / real / fc_ac+log_softmax in ONE pallas_call
#   sen = sigmoid(h_flat @ w_sen + b_sen)            (reads jointConv features)
#   yx  = x_flat @ [w_uncond | w_fc] + [b_u | b_fc]  (reads x_code features)
#   out = [ sen | sigmoid(yx[:,0]) | log_softmax(yx[:,1:]) ]
# ----------------------------------------------------------------------------
def _heads_kernel(hc_ref, xc_ref, wsen_ref, wx_ref, bsen_ref, bx_ref, o_ref, *, n_cls):
    sen = jnp.dot(hc_ref[...], wsen_ref[...], preferred_element_type=jnp.float32) + bsen_ref[...]
    yx = jnp.dot(xc_ref[...], wx_ref[...], preferred_element_type=jnp.float32) + bx_ref[...]
    o_ref[:, 0:1] = jax.nn.sigmoid(sen)             # sen_match
    o_ref[:, 1:2] = jax.nn.sigmoid(yx[:, 0:1])      # real (uncond)
    z = yx[:, 1:1 + n_cls]
    z = z - jnp.max(z, axis=-1, keepdims=True)
    o_ref[:, 2:2 + n_cls] = z - jnp.log(jnp.sum(jnp.exp(z), axis=-1, keepdims=True))


def fused_heads(h_flat, x_flat, w_sen, w_x, b_sen, b_x, n_cls):
    B, K = h_flat.shape
    Nx = w_x.shape[1]
    Nout = 2 + n_cls
    cost = pl.CostEstimate(
        flops=2 * B * K * (1 + Nx),
        transcendentals=B * (2 + 2 * n_cls),
        bytes_accessed=int(2 * (h_flat.size + x_flat.size) + 2 * (w_sen.size + w_x.size)
                           + 4 * (1 + Nx) + 4 * B * Nout),
    )
    kernel = functools.partial(_heads_kernel, n_cls=n_cls)
    return pl.pallas_call(
        kernel,
        out_shape=jax.ShapeDtypeStruct((B, Nout), jnp.float32),
        grid_spec=pltpu.PrefetchScalarGridSpec(
            num_scalar_prefetch=0,
            grid=(1,),
            in_specs=[
                pl.BlockSpec((B, K), lambda i: (0, 0)),
                pl.BlockSpec((B, K), lambda i: (0, 0)),
                pl.BlockSpec((K, 1), lambda i: (0, 0)),
                pl.BlockSpec((K, Nx), lambda i: (0, 0)),
                pl.BlockSpec((1, 1), lambda i: (0, 0)),
                pl.BlockSpec((1, Nx), lambda i: (0, 0)),
            ],
            out_specs=pl.BlockSpec((B, Nout), lambda i: (0, 0)),
        ),
        compiler_params=pltpu.CompilerParams(
            dimension_semantics=("arbitrary",),
            vmem_limit_bytes=16 * 1024 * 1024,
        ),
        cost_estimate=cost,
    )(h_flat.astype(jnp.bfloat16), x_flat.astype(jnp.bfloat16),
      w_sen.astype(jnp.bfloat16), w_x.astype(jnp.bfloat16),
      b_sen.astype(jnp.float32), b_x.astype(jnp.float32))


# ----------------------------------------------------------------------------
# Layout plumbing (XLA side): channel-major im2col, done once per conv layer
# ----------------------------------------------------------------------------
def im2col_cm(x, kh, kw, stride, pad):
    """x:(C, B, H, W) channel-major -> patches (C*kh*kw, B*Ho*Wo) (slicing only)."""
    if pad:
        x = jnp.pad(x, ((0, 0), (0, 0), (pad, pad), (pad, pad)))
    C, B, H, W = x.shape
    Ho = (H - kh) // stride + 1
    Wo = (W - kw) // stride + 1
    cols = []
    for i in range(kh):
        for j in range(kw):
            cols.append(x[:, :, i:i + stride * Ho:stride, j:j + stride * Wo:stride])
    p = jnp.stack(cols, axis=1)                 # (C, kh*kw, B, Ho, Wo)
    return p.reshape(C * kh * kw, B * Ho * Wo), Ho, Wo


def conv2d_cm(x, weight, scale, bias, stride, pad, act, tile_m=1024):
    """Conv2d on channel-major activations; BN scale folded into the weights."""
    O, C, kh, kw = weight.shape
    B = x.shape[1]
    patches, Ho, Wo = im2col_cm(x, kh, kw, stride, pad)
    K = C * kh * kw
    w2d = (weight.reshape(O, K) * scale[:, None]).astype(jnp.bfloat16)
    bias_col = bias.reshape(O, 1).astype(jnp.float32)
    out = fused_convT(w2d, patches.astype(jnp.bfloat16), bias_col, act, tile_m)
    return out.reshape(O, B, Ho, Wo)            # stays channel-major (C, B, H, W)


def bn_fold(gamma, beta, mean, var, eps=1e-5):
    scale = gamma / jnp.sqrt(var + eps)
    return scale, beta - mean * scale


# ----------------------------------------------------------------------------
# JOINT_D_NET64 (use_cap=False)
# ----------------------------------------------------------------------------
class JointDNet64:
    def __init__(self, key, df_dim=8, ef_dim=16, entity_num=5, dtype=jnp.float32):
        self.ndf = df_dim
        self.efg = ef_dim
        self.entity_num = entity_num
        keys = iter(jax.random.split(key, 64))
        p = {}

        def conv_w(o, i, k):
            fan_in = i * k * k
            return jax.random.normal(next(keys), (o, i, k, k), dtype) * (2.0 / fan_in) ** 0.5

        def bn(c):
            gamma = 1.0 + 0.1 * jax.random.normal(next(keys), (c,), dtype)
            beta = 0.1 * jax.random.normal(next(keys), (c,), dtype)
            mean = 0.1 * jax.random.normal(next(keys), (c,), dtype)
            var = 1.0 + 0.1 * jnp.abs(jax.random.normal(next(keys), (c,), dtype))
            return bn_fold(gamma, beta, mean, var)

        ndf, efg = self.ndf, self.efg
        # encode_image_by_16times(ndf)
        p["enc1_w"] = conv_w(ndf, 3, 4)
        p["enc2_w"] = conv_w(ndf * 2, ndf, 4)
        p["enc2_s"], p["enc2_b"] = bn(ndf * 2)
        p["enc3_w"] = conv_w(ndf * 4, ndf * 2, 4)
        p["enc3_s"], p["enc3_b"] = bn(ndf * 4)
        p["enc4_w"] = conv_w(ndf * 8, ndf * 4, 4)
        p["enc4_s"], p["enc4_b"] = bn(ndf * 8)
        # jointConv = Block3x3_leakRelu(ndf*8 + efg, ndf*8)
        p["joint_w"] = conv_w(ndf * 8, ndf * 8 + efg, 3)
        p["joint_s"], p["joint_b"] = bn(ndf * 8)
        # logits / uncond_logits: Conv2d(ndf*8, 1, k=4, s=4) + Sigmoid
        p["logits_w"] = conv_w(1, ndf * 8, 4)
        p["logits_b"] = 0.1 * jax.random.normal(next(keys), (1,), dtype)
        p["uncond_w"] = conv_w(1, ndf * 8, 4)
        p["uncond_b"] = 0.1 * jax.random.normal(next(keys), (1,), dtype)
        # fc_ac = Linear(ndf*8*4*4, entity_num+1)
        fc_in = ndf * 8 * 4 * 4
        p["fc_w"] = jax.random.normal(next(keys), (fc_in, entity_num + 1), dtype) * (1.0 / fc_in) ** 0.5
        p["fc_b"] = 0.1 * jax.random.normal(next(keys), (entity_num + 1,), dtype)
        self.params = p

    def __call__(self, x_var, c_code):
        p = self.params
        ndf, efg = self.ndf, self.efg
        B = x_var.shape[0]
        ones = lambda c: jnp.ones((c,), jnp.float32)
        zeros = lambda c: jnp.zeros((c,), jnp.float32)

        # One-time switch to channel-major (C, B, H, W); no NCHW round trips after.
        x = x_var.transpose(1, 0, 2, 3)

        # img_code_s16: 4x (4x4 stride-2 conv [+folded BN] + LeakyReLU), 64 -> 4 spatial
        h = conv2d_cm(x, p["enc1_w"], ones(ndf), zeros(ndf), 2, 1, "leaky_relu")
        h = conv2d_cm(h, p["enc2_w"], p["enc2_s"], p["enc2_b"], 2, 1, "leaky_relu")
        h = conv2d_cm(h, p["enc3_w"], p["enc3_s"], p["enc3_b"], 2, 1, "leaky_relu")
        x_code = conv2d_cm(h, p["enc4_w"], p["enc4_s"], p["enc4_b"], 2, 1, "leaky_relu")  # (64,B,4,4)

        # c_code.view(-1, efg, 1, 1).repeat(1, 1, 4, 4); cat along channels (channel-major)
        c4 = jnp.broadcast_to(c_code.T.reshape(efg, B, 1, 1), (efg, B, 4, 4))
        h_c_in = jnp.concatenate([c4, x_code], axis=0)                       # (80, B, 4, 4)

        # jointConv: 3x3 conv + folded BN + LeakyReLU
        h_c = conv2d_cm(h_c_in, p["joint_w"], p["joint_s"], p["joint_b"], 1, 1, "leaky_relu")

        # Flatten per batch in (C, H, W) order (matches torch .view); tiny 4x4 tensors.
        x_flat = x_code.transpose(1, 0, 2, 3).reshape(B, -1)
        h_flat = h_c.transpose(1, 0, 2, 3).reshape(B, -1)

        # Fused heads: logits(sigmoid) + uncond(sigmoid) + fc_ac(log_softmax) in one call.
        K_head = ndf * 8 * 4 * 4
        n_cls = self.entity_num + 1
        w_sen = p["logits_w"].reshape(1, K_head).T                           # (1024, 1)
        w_un = p["uncond_w"].reshape(1, K_head).T                            # (1024, 1)
        w_x = jnp.concatenate([w_un, p["fc_w"]], axis=1)                     # (1024, 1+n_cls)
        b_sen = p["logits_b"].reshape(1, 1)
        b_x = jnp.concatenate([p["uncond_b"], p["fc_b"]]).reshape(1, -1)

        out = fused_heads(h_flat, x_flat, w_sen, w_x, b_sen, b_x, n_cls)     # (B, 2+n_cls)
        sen_match = out[:, 0]
        real = out[:, 1]
        cp = out[:, 2:]
        return [sen_match, real, cp]


# ----------------------------------------------------------------------------
# Pure-XLA reference (bf16 MXU inputs / f32 accumulation, matching the kernels)
# ----------------------------------------------------------------------------
def reference_forward(model, x_var, c_code):
    p = model.params
    ndf, efg = model.ndf, model.efg
    bf = jnp.bfloat16

    def conv(x, w, s, b, stride, pad, act):
        wf = (w * s.reshape(-1, 1, 1, 1)).astype(bf)
        y = jax.lax.conv_general_dilated(
            x.astype(bf), wf, (stride, stride), [(pad, pad), (pad, pad)],
            dimension_numbers=("NCHW", "OIHW", "NCHW"),
            preferred_element_type=jnp.float32)
        y = y + b.reshape(1, -1, 1, 1)
        if act == "leaky_relu":
            y = jnp.where(y > 0, y, 0.2 * y)
        return y

    def head_mm(a, w):
        return jnp.dot(a.astype(bf), w.astype(bf), preferred_element_type=jnp.float32)

    ones = lambda c: jnp.ones((c,), jnp.float32)
    zeros = lambda c: jnp.zeros((c,), jnp.float32)
    h = conv(x_var, p["enc1_w"], ones(ndf), zeros(ndf), 2, 1, "leaky_relu")
    h = conv(h, p["enc2_w"], p["enc2_s"], p["enc2_b"], 2, 1, "leaky_relu")
    h = conv(h, p["enc3_w"], p["enc3_s"], p["enc3_b"], 2, 1, "leaky_relu")
    x_code = conv(h, p["enc4_w"], p["enc4_s"], p["enc4_b"], 2, 1, "leaky_relu")
    B = x_code.shape[0]
    c4 = jnp.broadcast_to(c_code.reshape(B, efg, 1, 1), (B, efg, 4, 4))
    h_c = conv(jnp.concatenate([c4, x_code], axis=1),
               p["joint_w"], p["joint_s"], p["joint_b"], 1, 1, "leaky_relu")

    x_flat = x_code.reshape(B, -1)
    h_flat = h_c.reshape(B, -1)
    w_sen = p["logits_w"].reshape(1, -1).T
    w_un = p["uncond_w"].reshape(1, -1).T
    sen = jax.nn.sigmoid(head_mm(h_flat, w_sen).reshape(-1) + p["logits_b"])
    real = jax.nn.sigmoid(head_mm(x_flat, w_un).reshape(-1) + p["uncond_b"])
    cp = jax.nn.log_softmax(head_mm(x_flat, p["fc_w"]) + p["fc_b"], axis=-1)
    return [sen, real, cp]


if __name__ == "__main__":
    key = jax.random.PRNGKey(0)
    k_param, k_x, k_c = jax.random.split(key, 3)

    df_dim, ef_dim, entity_num = 8, 16, 5
    B = 2
    model = JointDNet64(k_param, df_dim=df_dim, ef_dim=ef_dim, entity_num=entity_num)

    # D_NET64 operates on 64x64 RGB images (16x downsample -> 4x4 feature map).
    x_var = jax.random.normal(k_x, (B, 3, 64, 64), dtype=jnp.float32)
    c_code = jax.random.normal(k_c, (B, ef_dim), dtype=jnp.float32)

    fwd = jax.jit(lambda xv, cc: model(xv, cc))
    sen_match, real, cp = fwd(x_var, c_code)
    sen_match = jax.block_until_ready(sen_match)
    real = jax.block_until_ready(real)
    cp = jax.block_until_ready(cp)

    # Shape checks (match the PyTorch forward's return shapes).
    assert sen_match.shape == (B,), sen_match.shape
    assert real.shape == (B,), real.shape
    assert cp.shape == (B, entity_num + 1), cp.shape

    # Numerical check against an XLA reference using the same bf16-MXU / f32-accumulate
    # quantization (differences are accumulation-order only).
    ref_sen, ref_real, ref_cp = reference_forward(model, x_var, c_code)
    assert bool(jnp.allclose(sen_match, ref_sen, rtol=1e-2, atol=1e-2))
    assert bool(jnp.allclose(real, ref_real, rtol=1e-2, atol=1e-2))
    assert bool(jnp.allclose(cp, ref_cp, rtol=1e-2, atol=1e-2))
    assert bool(jnp.all(jnp.isfinite(cp)))

    print("KERNEL_OK")
</pallas_src>

<mosaic_0001>
module attributes {stable_mosaic.version = 11 : i64} {
  func.func @_convT_kernel(%arg0: i32, %arg1: memref<8x48xbf16, #tpu.memory_space<vmem>>, %arg2: memref<48x1024xbf16, #tpu.memory_space<vmem>>, %arg3: memref<8x1xf32, #tpu.memory_space<vmem>>, %arg4: memref<8x1024xbf16, #tpu.memory_space<vmem>>) attributes {dimension_semantics = [#tpu.dimension_semantics<parallel>], iteration_bounds = array<i64: 2>, scalar_prefetch = 0 : i64, scratch_operands = 0 : i64, tpu.core_type = #tpu.core_type<tc>, window_params = [{pipeline_mode = #tpu.pipeline_mode<synchronous>, transform_indices = @transform_0, window_bounds = array<i64: 8, 48>}, {transform_indices = @transform_1, window_bounds = array<i64: 48, 1024>}, {pipeline_mode = #tpu.pipeline_mode<synchronous>, transform_indices = @transform_2, window_bounds = array<i64: 8, 1>}, {transform_indices = @transform_3, window_bounds = array<i64: 8, 1024>}]} {
    %c0 = arith.constant 0 : index
    %c0_0 = arith.constant 0 : index
    %0 = vector.load %arg1[%c0, %c0_0] : memref<8x48xbf16, #tpu.memory_space<vmem>>, vector<8x48xbf16>
    %c0_1 = arith.constant 0 : index
    %c0_2 = arith.constant 0 : index
    %1 = vector.load %arg2[%c0_1, %c0_2] : memref<48x1024xbf16, #tpu.memory_space<vmem>>, vector<48x1024xbf16>
    %cst = arith.constant dense<0.000000e+00> : vector<8x1024xf32>
    %2 = tpu.matmul %0, %1, %cst {dimension_numbers = #tpu.dot_dimension_numbers<[1], [0], [0], [1], [0, 0, 1, 1], [], []>} : vector<8x48xbf16>, vector<48x1024xbf16>, vector<8x1024xf32> -> vector<8x1024xf32>
    %c0_3 = arith.constant 0 : index
    %c0_4 = arith.constant 0 : index
    %3 = vector.load %arg3[%c0_3, %c0_4] : memref<8x1xf32, #tpu.memory_space<vmem>>, vector<8x1xf32>
    %4 = vector.broadcast %3 : vector<8x1xf32> to vector<8x1024xf32>
    %5 = arith.addf %2, %4 : vector<8x1024xf32>
    %cst_5 = arith.constant 0.000000e+00 : f32
    %6 = vector.broadcast %cst_5 : f32 to vector<8x1024xf32>
    %7 = arith.cmpf ogt, %5, %6 : vector<8x1024xf32>
    %cst_6 = arith.constant 2.000000e-01 : f32
    %8 = vector.broadcast %cst_6 : f32 to vector<8x1024xf32>
    %9 = arith.mulf %8, %5 : vector<8x1024xf32>
    %10 = arith.select %7, %5, %9 : vector<8x1024xi1>, vector<8x1024xf32>
    %11 = arith.truncf %10 : vector<8x1024xf32> to vector<8x1024xbf16>
    %c0_7 = arith.constant 0 : index
    %c0_8 = arith.constant 0 : index
    %12 = vector.load %arg4[%c0_7, %c0_8] : memref<8x1024xbf16, #tpu.memory_space<vmem>>, vector<8x1024xbf16>
    tpu.vector_store %arg4[%c0_7, %c0_8], %11 {strides = array<i32>} : memref<8x1024xbf16, #tpu.memory_space<vmem>>, vector<8x1024xbf16>,
    return
  }
  func.func @transform_0(%arg0: i32) -> (i32, i32) {
    %c0_i32 = arith.constant 0 : i32
    %c0_i32_0 = arith.constant 0 : i32
    %c0_i32_1 = arith.constant 0 : i32
    return %c0_i32, %c0_i32_0 : i32, i32
  }
  func.func @transform_1(%arg0: i32) -> (i32, i32) {
    %c0_i32 = arith.constant 0 : i32
    %c0_i32_0 = arith.constant 0 : i32
    return %c0_i32, %arg0 : i32, i32
  }
  func.func @transform_2(%arg0: i32) -> (i32, i32) {
    %c0_i32 = arith.constant 0 : i32
    %c0_i32_0 = arith.constant 0 : i32
    %c0_i32_1 = arith.constant 0 : i32
    return %c0_i32, %c0_i32_0 : i32, i32
  }
  func.func @transform_3(%arg0: i32) -> (i32, i32) {
    %c0_i32 = arith.constant 0 : i32
    %c0_i32_0 = arith.constant 0 : i32
    return %c0_i32, %arg0 : i32, i32
  }
}

module attributes {stable_mosaic.version = 11 : i64} {
  func.func @_convT_kernel(%arg0: i32, %arg1: memref<16x128xbf16, #tpu.memory_space<vmem>>, %arg2: memref<128x512xbf16, #tpu.memory_space<vmem>>, %arg3: memref<16x1xf32, #tpu.memory_space<vmem>>, %arg4: memref<16x512xbf16, #tpu.memory_space<vmem>>) attributes {dimension_semantics = [#tpu.dimension_semantics<parallel>], iteration_bounds = array<i64: 1>, scalar_prefetch = 0 : i64, scratch_operands = 0 : i64, tpu.core_type = #tpu.core_type<tc>, window_params = [{pipeline_mode = #tpu.pipeline_mode<synchronous>, transform_indices = @transform_0, window_bounds = array<i64: 16, 128>}, {transform_indices = @transform_1, window_bounds = array<i64: 128, 512>}, {pipeline_mode = #tpu.pipeline_mode<synchronous>, transform_indices = @transform_2, window_bounds = array<i64: 16, 1>}, {transform_indices = @transform_3, window_bounds = array<i64: 16, 512>}]} {
    %c0 = arith.constant 0 : index
    %c0_0 = arith.constant 0 : index
    %0 = vector.load %arg1[%c0, %c0_0] : memref<16x128xbf16, #tpu.memory_space<vmem>>, vector<16x128xbf16>
    %c0_1 = arith.constant 0 : index
    %c0_2 = arith.constant 0 : index
    %1 = vector.load %arg2[%c0_1, %c0_2] : memref<128x512xbf16, #tpu.memory_space<vmem>>, vector<128x512xbf16>
    %cst = arith.constant dense<0.000000e+00> : vector<16x512xf32>
    %2 = tpu.matmul %0, %1, %cst {dimension_numbers = #tpu.dot_dimension_numbers<[1], [0], [0], [1], [0, 0, 1, 1], [], []>} : vector<16x128xbf16>, vector<128x512xbf16>, vector<16x512xf32> -> vector<16x512xf32>
    %c0_3 = arith.constant 0 : index
    %c0_4 = arith.constant 0 : index
    %3 = vector.load %arg3[%c0_3, %c0_4] : memref<16x1xf32, #tpu.memory_space<vmem>>, vector<16x1xf32>
    %4 = vector.broadcast %3 : vector<16x1xf32> to vector<16x512xf32>
    %5 = arith.addf %2, %4 : vector<16x512xf32>
    %cst_5 = arith.constant 0.000000e+00 : f32
    %6 = vector.broadcast %cst_5 : f32 to vector<16x512xf32>
    %7 = arith.cmpf ogt, %5, %6 : vector<16x512xf32>
    %cst_6 = arith.constant 2.000000e-01 : f32
    %8 = vector.broadcast %cst_6 : f32 to vector<16x512xf32>
    %9 = arith.mulf %8, %5 : vector<16x512xf32>
    %10 = arith.select %7, %5, %9 : vector<16x512xi1>, vector<16x512xf32>
    %11 = arith.truncf %10 : vector<16x512xf32> to vector<16x512xbf16>
    %c0_7 = arith.constant 0 : index
    %c0_8 = arith.constant 0 : index
    %12 = vector.load %arg4[%c0_7, %c0_8] : memref<16x512xbf16, #tpu.memory_space<vmem>>, vector<16x512xbf16>
    tpu.vector_store %arg4[%c0_7, %c0_8], %11 {strides = array<i32>} : memref<16x512xbf16, #tpu.memory_space<vmem>>, vector<16x512xbf16>,
    return
  }
  func.func @transform_0(%arg0: i32) -> (i32, i32) {
    %c0_i32 = arith.constant 0 : i32
    %c0_i32_0 = arith.constant 0 : i32
    %c0_i32_1 = arith.constant 0 : i32
    return %c0_i32, %c0_i32_0 : i32, i32
  }
  func.func @transform_1(%arg0: i32) -> (i32, i32) {
    %c0_i32 = arith.constant 0 : i32
    %c0_i32_0 = arith.constant 0 : i32
    return %c0_i32, %arg0 : i32, i32
  }
  func.func @transform_2(%arg0: i32) -> (i32, i32) {
    %c0_i32 = arith.constant 0 : i32
    %c0_i32_0 = arith.constant 0 : i32
    %c0_i32_1 = arith.constant 0 : i32
    return %c0_i32, %c0_i32_0 : i32, i32
  }
  func.func @transform_3(%arg0: i32) -> (i32, i32) {
    %c0_i32 = arith.constant 0 : i32
    %c0_i32_0 = arith.constant 0 : i32
    return %c0_i32, %arg0 : i32, i32
  }
}

module attributes {stable_mosaic.version = 11 : i64} {
  func.func @_convT_kernel(%arg0: i32, %arg1: memref<32x256xbf16, #tpu.memory_space<vmem>>, %arg2: memref<256x128xbf16, #tpu.memory_space<vmem>>, %arg3: memref<32x1xf32, #tpu.memory_space<vmem>>, %arg4: memref<32x128xbf16, #tpu.memory_space<vmem>>) attributes {dimension_semantics = [#tpu.dimension_semantics<parallel>], iteration_bounds = array<i64: 1>, scalar_prefetch = 0 : i64, scratch_operands = 0 : i64, tpu.core_type = #tpu.core_type<tc>, window_params = [{pipeline_mode = #tpu.pipeline_mode<synchronous>, transform_indices = @transform_0, window_bounds = array<i64: 32, 256>}, {transform_indices = @transform_1, window_bounds = array<i64: 256, 128>}, {pipeline_mode = #tpu.pipeline_mode<synchronous>, transform_indices = @transform_2, window_bounds = array<i64: 32, 1>}, {transform_indices = @transform_3, window_bounds = array<i64: 32, 128>}]} {
    %c0 = arith.constant 0 : index
    %c0_0 = arith.constant 0 : index
    %0 = vector.load %arg1[%c0, %c0_0] : memref<32x256xbf16, #tpu.memory_space<vmem>>, vector<32x256xbf16>
    %c0_1 = arith.constant 0 : index
    %c0_2 = arith.constant 0 : index
    %1 = vector.load %arg2[%c0_1, %c0_2] : memref<256x128xbf16, #tpu.memory_space<vmem>>, vector<256x128xbf16>
    %cst = arith.constant dense<0.000000e+00> : vector<32x128xf32>
    %2 = tpu.matmul %0, %1, %cst {dimension_numbers = #tpu.dot_dimension_numbers<[1], [0], [0], [1], [0, 0, 1, 1], [], []>} : vector<32x256xbf16>, vector<256x128xbf16>, vector<32x128xf32> -> vector<32x128xf32>
    %c0_3 = arith.constant 0 : index
    %c0_4 = arith.constant 0 : index
    %3 = vector.load %arg3[%c0_3, %c0_4] : memref<32x1xf32, #tpu.memory_space<vmem>>, vector<32x1xf32>
    %4 = vector.broadcast %3 : vector<32x1xf32> to vector<32x128xf32>
    %5 = arith.addf %2, %4 : vector<32x128xf32>
    %cst_5 = arith.constant 0.000000e+00 : f32
    %6 = vector.broadcast %cst_5 : f32 to vector<32x128xf32>
    %7 = arith.cmpf ogt, %5, %6 : vector<32x128xf32>
    %cst_6 = arith.constant 2.000000e-01 : f32
    %8 = vector.broadcast %cst_6 : f32 to vector<32x128xf32>
    %9 = arith.mulf %8, %5 : vector<32x128xf32>
    %10 = arith.select %7, %5, %9 : vector<32x128xi1>, vector<32x128xf32>
    %11 = arith.truncf %10 : vector<32x128xf32> to vector<32x128xbf16>
    %c0_7 = arith.constant 0 : index
    %c0_8 = arith.constant 0 : index
    %12 = vector.load %arg4[%c0_7, %c0_8] : memref<32x128xbf16, #tpu.memory_space<vmem>>, vector<32x128xbf16>
    tpu.vector_store %arg4[%c0_7, %c0_8], %11 {strides = array<i32>} : memref<32x128xbf16, #tpu.memory_space<vmem>>, vector<32x128xbf16>,
    return
  }
  func.func @transform_0(%arg0: i32) -> (i32, i32) {
    %c0_i32 = arith.constant 0 : i32
    %c0_i32_0 = arith.constant 0 : i32
    %c0_i32_1 = arith.constant 0 : i32
    return %c0_i32, %c0_i32_0 : i32, i32
  }
  func.func @transform_1(%arg0: i32) -> (i32, i32) {
    %c0_i32 = arith.constant 0 : i32
    %c0_i32_0 = arith.constant 0 : i32
    return %c0_i32, %arg0 : i32, i32
  }
  func.func @transform_2(%arg0: i32) -> (i32, i32) {
    %c0_i32 = arith.constant 0 : i32
    %c0_i32_0 = arith.constant 0 : i32
    %c0_i32_1 = arith.constant 0 : i32
    return %c0_i32, %c0_i32_0 : i32, i32
  }
  func.func @transform_3(%arg0: i32) -> (i32, i32) {
    %c0_i32 = arith.constant 0 : i32
    %c0_i32_0 = arith.constant 0 : i32
    return %c0_i32, %arg0 : i32, i32
  }
}

module attributes {stable_mosaic.version = 11 : i64} {
  func.func @_convT_kernel(%arg0: i32, %arg1: memref<64x512xbf16, #tpu.memory_space<vmem>>, %arg2: memref<512x32xbf16, #tpu.memory_space<vmem>>, %arg3: memref<64x1xf32, #tpu.memory_space<vmem>>, %arg4: memref<64x32xbf16, #tpu.memory_space<vmem>>) attributes {dimension_semantics = [#tpu.dimension_semantics<parallel>], iteration_bounds = array<i64: 1>, scalar_prefetch = 0 : i64, scratch_operands = 0 : i64, tpu.core_type = #tpu.core_type<tc>, window_params = [{pipeline_mode = #tpu.pipeline_mode<synchronous>, transform_indices = @transform_0, window_bounds = array<i64: 64, 512>}, {transform_indices = @transform_1, window_bounds = array<i64: 512, 32>}, {pipeline_mode = #tpu.pipeline_mode<synchronous>, transform_indices = @transform_2, window_bounds = array<i64: 64, 1>}, {transform_indices = @transform_3, window_bounds = array<i64: 64, 32>}]} {
    %c0 = arith.constant 0 : index
    %c0_0 = arith.constant 0 : index
    %0 = vector.load %arg1[%c0, %c0_0] : memref<64x512xbf16, #tpu.memory_space<vmem>>, vector<64x512xbf16>
    %c0_1 = arith.constant 0 : index
    %c0_2 = arith.constant 0 : index
    %1 = vector.load %arg2[%c0_1, %c0_2] : memref<512x32xbf16, #tpu.memory_space<vmem>>, vector<512x32xbf16>
    %cst = arith.constant dense<0.000000e+00> : vector<64x32xf32>
    %2 = tpu.matmul %0, %1, %cst {dimension_numbers = #tpu.dot_dimension_numbers<[1], [0], [0], [1], [0, 0, 1, 1], [], []>} : vector<64x512xbf16>, vector<512x32xbf16>, vector<64x32xf32> -> vector<64x32xf32>
    %c0_3 = arith.constant 0 : index
    %c0_4 = arith.constant 0 : index
    %3 = vector.load %arg3[%c0_3, %c0_4] : memref<64x1xf32, #tpu.memory_space<vmem>>, vector<64x1xf32>
    %4 = vector.broadcast %3 : vector<64x1xf32> to vector<64x32xf32>
    %5 = arith.addf %2, %4 : vector<64x32xf32>
    %cst_5 = arith.constant 0.000000e+00 : f32
    %6 = vector.broadcast %cst_5 : f32 to vector<64x32xf32>
    %7 = arith.cmpf ogt, %5, %6 : vector<64x32xf32>
    %cst_6 = arith.constant 2.000000e-01 : f32
    %8 = vector.broadcast %cst_6 : f32 to vector<64x32xf32>
    %9 = arith.mulf %8, %5 : vector<64x32xf32>
    %10 = arith.select %7, %5, %9 : vector<64x32xi1>, vector<64x32xf32>
    %11 = arith.truncf %10 : vector<64x32xf32> to vector<64x32xbf16>
    %c0_7 = arith.constant 0 : index
    %c0_8 = arith.constant 0 : index
    %12 = vector.load %arg4[%c0_7, %c0_8] : memref<64x32xbf16, #tpu.memory_space<vmem>>, vector<64x32xbf16>
    tpu.vector_store %arg4[%c0_7, %c0_8], %11 {strides = array<i32>} : memref<64x32xbf16, #tpu.memory_space<vmem>>, vector<64x32xbf16>,
    return
  }
  func.func @transform_0(%arg0: i32) -> (i32, i32) {
    %c0_i32 = arith.constant 0 : i32
    %c0_i32_0 = arith.constant 0 : i32
    %c0_i32_1 = arith.constant 0 : i32
    return %c0_i32, %c0_i32_0 : i32, i32
  }
  func.func @transform_1(%arg0: i32) -> (i32, i32) {
    %c0_i32 = arith.constant 0 : i32
    %c0_i32_0 = arith.constant 0 : i32
    return %c0_i32, %arg0 : i32, i32
  }
  func.func @transform_2(%arg0: i32) -> (i32, i32) {
    %c0_i32 = arith.constant 0 : i32
    %c0_i32_0 = arith.constant 0 : i32
    %c0_i32_1 = arith.constant 0 : i32
    return %c0_i32, %c0_i32_0 : i32, i32
  }
  func.func @transform_3(%arg0: i32) -> (i32, i32) {
    %c0_i32 = arith.constant 0 : i32
    %c0_i32_0 = arith.constant 0 : i32
    return %c0_i32, %arg0 : i32, i32
  }
}

module attributes {stable_mosaic.version = 11 : i64} {
  func.func @_convT_kernel(%arg0: i32, %arg1: memref<64x720xbf16, #tpu.memory_space<vmem>>, %arg2: memref<720x32xbf16, #tpu.memory_space<vmem>>, %arg3: memref<64x1xf32, #tpu.memory_space<vmem>>, %arg4: memref<64x32xbf16, #tpu.memory_space<vmem>>) attributes {dimension_semantics = [#tpu.dimension_semantics<parallel>], iteration_bounds = array<i64: 1>, scalar_prefetch = 0 : i64, scratch_operands = 0 : i64, tpu.core_type = #tpu.core_type<tc>, window_params = [{pipeline_mode = #tpu.pipeline_mode<synchronous>, transform_indices = @transform_0, window_bounds = array<i64: 64, 720>}, {transform_indices = @transform_1, window_bounds = array<i64: 720, 32>}, {pipeline_mode = #tpu.pipeline_mode<synchronous>, transform_indices = @transform_2, window_bounds = array<i64: 64, 1>}, {transform_indices = @transform_3, window_bounds = array<i64: 64, 32>}]} {
    %c0 = arith.constant 0 : index
    %c0_0 = arith.constant 0 : index
    %0 = vector.load %arg1[%c0, %c0_0] : memref<64x720xbf16, #tpu.memory_space<vmem>>, vector<64x720xbf16>
    %c0_1 = arith.constant 0 : index
    %c0_2 = arith.constant 0 : index
    %1 = vector.load %arg2[%c0_1, %c0_2] : memref<720x32xbf16, #tpu.memory_space<vmem>>, vector<720x32xbf16>
    %cst = arith.constant dense<0.000000e+00> : vector<64x32xf32>
    %2 = tpu.matmul %0, %1, %cst {dimension_numbers = #tpu.dot_dimension_numbers<[1], [0], [0], [1], [0, 0, 1, 1], [], []>} : vector<64x720xbf16>, vector<720x32xbf16>, vector<64x32xf32> -> vector<64x32xf32>
    %c0_3 = arith.constant 0 : index
    %c0_4 = arith.constant 0 : index
    %3 = vector.load %arg3[%c0_3, %c0_4] : memref<64x1xf32, #tpu.memory_space<vmem>>, vector<64x1xf32>
    %4 = vector.broadcast %3 : vector<64x1xf32> to vector<64x32xf32>
    %5 = arith.addf %2, %4 : vector<64x32xf32>
    %cst_5 = arith.constant 0.000000e+00 : f32
    %6 = vector.broadcast %cst_5 : f32 to vector<64x32xf32>
    %7 = arith.cmpf ogt, %5, %6 : vector<64x32xf32>
    %cst_6 = arith.constant 2.000000e-01 : f32
    %8 = vector.broadcast %cst_6 : f32 to vector<64x32xf32>
    %9 = arith.mulf %8, %5 : vector<64x32xf32>
    %10 = arith.select %7, %5, %9 : vector<64x32xi1>, vector<64x32xf32>
    %11 = arith.truncf %10 : vector<64x32xf32> to vector<64x32xbf16>
    %c0_7 = arith.constant 0 : index
    %c0_8 = arith.constant 0 : index
    %12 = vector.load %arg4[%c0_7, %c0_8] : memref<64x32xbf16, #tpu.memory_space<vmem>>, vector<64x32xbf16>
    tpu.vector_store %arg4[%c0_7, %c0_8], %11 {strides = array<i32>} : memref<64x32xbf16, #tpu.memory_space<vmem>>, vector<64x32xbf16>,
    return
  }
  func.func @transform_0(%arg0: i32) -> (i32, i32) {
    %c0_i32 = arith.constant 0 : i32
    %c0_i32_0 = arith.constant 0 : i32
    %c0_i32_1 = arith.constant 0 : i32
    return %c0_i32, %c0_i32_0 : i32, i32
  }
  func.func @transform_1(%arg0: i32) -> (i32, i32) {
    %c0_i32 = arith.constant 0 : i32
    %c0_i32_0 = arith.constant 0 : i32
    return %c0_i32, %arg0 : i32, i32
  }
  func.func @transform_2(%arg0: i32) -> (i32, i32) {
    %c0_i32 = arith.constant 0 : i32
    %c0_i32_0 = arith.constant 0 : i32
    %c0_i32_1 = arith.constant 0 : i32
    return %c0_i32, %c0_i32_0 : i32, i32
  }
  func.func @transform_3(%arg0: i32) -> (i32, i32) {
    %c0_i32 = arith.constant 0 : i32
    %c0_i32_0 = arith.constant 0 : i32
    return %c0_i32, %arg0 : i32, i32
  }
}

module attributes {stable_mosaic.version = 11 : i64} {
  func.func @_heads_kernel(%arg0: i32, %arg1: memref<2x1024xbf16, #tpu.memory_space<vmem>>, %arg2: memref<2x1024xbf16, #tpu.memory_space<vmem>>, %arg3: memref<1024x1xbf16, #tpu.memory_space<vmem>>, %arg4: memref<1024x7xbf16, #tpu.memory_space<vmem>>, %arg5: memref<1x1xf32, #tpu.memory_space<vmem>>, %arg6: memref<1x7xf32, #tpu.memory_space<vmem>>, %arg7: memref<2x8xf32, #tpu.memory_space<vmem>>) attributes {dimension_semantics = [#tpu.dimension_semantics<arbitrary>], iteration_bounds = array<i64: 1>, scalar_prefetch = 0 : i64, scratch_operands = 0 : i64, tpu.core_type = #tpu.core_type<tc>, window_params = [{pipeline_mode = #tpu.pipeline_mode<synchronous>, transform_indices = @transform_0, window_bounds = array<i64: 2, 1024>}, {pipeline_mode = #tpu.pipeline_mode<synchronous>, transform_indices = @transform_1, window_bounds = array<i64: 2, 1024>}, {pipeline_mode = #tpu.pipeline_mode<synchronous>, transform_indices = @transform_2, window_bounds = array<i64: 1024, 1>}, {pipeline_mode = #tpu.pipeline_mode<synchronous>, transform_indices = @transform_3, window_bounds = array<i64: 1024, 7>}, {pipeline_mode = #tpu.pipeline_mode<synchronous>, transform_indices = @transform_4, window_bounds = array<i64: 1, 1>}, {pipeline_mode = #tpu.pipeline_mode<synchronous>, transform_indices = @transform_5, window_bounds = array<i64: 1, 7>}, {pipeline_mode = #tpu.pipeline_mode<synchronous>, transform_indices = @transform_6, window_bounds = array<i64: 2, 8>}]} {
    %c0 = arith.constant 0 : index
    %c0_0 = arith.constant 0 : index
    %0 = vector.load %arg1[%c0, %c0_0] : memref<2x1024xbf16, #tpu.memory_space<vmem>>, vector<2x1024xbf16>
    %c0_1 = arith.constant 0 : index
    %c0_2 = arith.constant 0 : index
    %1 = vector.load %arg3[%c0_1, %c0_2] : memref<1024x1xbf16, #tpu.memory_space<vmem>>, vector<1024x1xbf16>
    %cst = arith.constant dense<0.000000e+00> : vector<2x1xf32>
    %2 = tpu.matmul %0, %1, %cst {dimension_numbers = #tpu.dot_dimension_numbers<[1], [0], [0], [1], [0, 0, 1, 1], [], []>} : vector<2x1024xbf16>, vector<1024x1xbf16>, vector<2x1xf32> -> vector<2x1xf32>
    %c0_3 = arith.constant 0 : index
    %c0_4 = arith.constant 0 : index
    %3 = vector.load %arg5[%c0_3, %c0_4] : memref<1x1xf32, #tpu.memory_space<vmem>>, vector<1x1xf32>
    %4 = vector.broadcast %3 : vector<1x1xf32> to vector<2x1xf32>
    %5 = arith.addf %2, %4 : vector<2x1xf32>
    %c0_5 = arith.constant 0 : index
    %c0_6 = arith.constant 0 : index
    %6 = vector.load %arg2[%c0_5, %c0_6] : memref<2x1024xbf16, #tpu.memory_space<vmem>>, vector<2x1024xbf16>
    %c0_7 = arith.constant 0 : index
    %c0_8 = arith.constant 0 : index
    %7 = vector.load %arg4[%c0_7, %c0_8] : memref<1024x7xbf16, #tpu.memory_space<vmem>>, vector<1024x7xbf16>
    %cst_9 = arith.constant dense<0.000000e+00> : vector<2x7xf32>
    %8 = tpu.matmul %6, %7, %cst_9 {dimension_numbers = #tpu.dot_dimension_numbers<[1], [0], [0], [1], [0, 0, 1, 1], [], []>} : vector<2x1024xbf16>, vector<1024x7xbf16>, vector<2x7xf32> -> vector<2x7xf32>
    %c0_10 = arith.constant 0 : index
    %c0_11 = arith.constant 0 : index
    %9 = vector.load %arg6[%c0_10, %c0_11] : memref<1x7xf32, #tpu.memory_space<vmem>>, vector<1x7xf32>
    %10 = vector.broadcast %9 : vector<1x7xf32> to vector<2x7xf32>
    %11 = arith.addf %8, %10 : vector<2x7xf32>
    %12 = arith.negf %5 : vector<2x1xf32>
    %13 = math.exp %12 : vector<2x1xf32>
    %cst_12 = arith.constant 1.000000e+00 : f32
    %14 = vector.broadcast %cst_12 : f32 to vector<2x1xf32>
    %15 = arith.addf %14, %13 : vector<2x1xf32>
    %16 = arith.divf %14, %15 : vector<2x1xf32>
    %c0_13 = arith.constant 0 : index
    %c0_14 = arith.constant 0 : index
    %17 = vector.load %arg7[%c0_13, %c0_14] : memref<2x8xf32, #tpu.memory_space<vmem>>, vector<2x1xf32>
    tpu.vector_store %arg7[%c0_13, %c0_14], %16 {strides = array<i32>} : memref<2x8xf32, #tpu.memory_space<vmem>>, vector<2x1xf32>,
    %18 = vector.extract_strided_slice %11 {offsets = [0, 0], sizes = [2, 1], strides = [1, 1]} : vector<2x7xf32> to vector<2x1xf32>
    %19 = arith.negf %18 : vector<2x1xf32>
    %20 = math.exp %19 : vector<2x1xf32>
    %cst_15 = arith.constant 1.000000e+00 : f32
    %21 = vector.broadcast %cst_15 : f32 to vector<2x1xf32>
    %22 = arith.addf %21, %20 : vector<2x1xf32>
    %23 = arith.divf %21, %22 : vector<2x1xf32>
    %c0_16 = arith.constant 0 : index
    %c1 = arith.constant 1 : index
    %24 = vector.load %arg7[%c0_16, %c1] : memref<2x8xf32, #tpu.memory_space<vmem>>, vector<2x1xf32>
    tpu.vector_store %arg7[%c0_16, %c1], %23 {strides = array<i32>} : memref<2x8xf32, #tpu.memory_space<vmem>>, vector<2x1xf32>,
    %25 = vector.extract_strided_slice %11 {offsets = [0, 1], sizes = [2, 6], strides = [1, 1]} : vector<2x7xf32> to vector<2x6xf32>
    %cst_17 = arith.constant dense<0xFF800000> : vector<2xf32>
    %26 = vector.multi_reduction <maximumf>, %25, %cst_17 [1] : vector<2x6xf32> to vector<2xf32>
    %27 = vector.shape_cast %26 : vector<2xf32> to vector<2x1xf32>
    %28 = vector.broadcast %27 : vector<2x1xf32> to vector<2x6xf32>
    %29 = arith.subf %25, %28 : vector<2x6xf32>
    %30 = math.exp %29 : vector<2x6xf32>
    %cst_18 = arith.constant dense<0.000000e+00> : vector<2xf32>
    %31 = vector.multi_reduction <add>, %30, %cst_18 [1] : vector<2x6xf32> to vector<2xf32>
    %32 = vector.shape_cast %31 : vector<2xf32> to vector<2x1xf32>
    %33 = math.log %32 : vector<2x1xf32>
    %34 = vector.broadcast %33 : vector<2x1xf32> to vector<2x6xf32>
    %35 = arith.subf %29, %34 : vector<2x6xf32>
    %c0_19 = arith.constant 0 : index
    %c2 = arith.constant 2 : index
    %36 = vector.load %arg7[%c0_19, %c2] : memref<2x8xf32, #tpu.memory_space<vmem>>, vector<2x6xf32>
    tpu.vector_store %arg7[%c0_19, %c2], %35 {strides = array<i32>} : memref<2x8xf32, #tpu.memory_space<vmem>>, vector<2x6xf32>,
    return
  }
  func.func @transform_0(%arg0: i32) -> (i32, i32) {
    %c0_i32 = arith.constant 0 : i32
    %c0_i32_0 = arith.constant 0 : i32
    %c0_i32_1 = arith.constant 0 : i32
    return %c0_i32, %c0_i32_0 : i32, i32
  }
  func.func @transform_1(%arg0: i32) -> (i32, i32) {
    %c0_i32 = arith.constant 0 : i32
    %c0_i32_0 = arith.constant 0 : i32
    %c0_i32_1 = arith.constant 0 : i32
    return %c0_i32, %c0_i32_0 : i32, i32
  }
  func.func @transform_2(%arg0: i32) -> (i32, i32) {
    %c0_i32 = arith.constant 0 : i32
    %c0_i32_0 = arith.constant 0 : i32
    %c0_i32_1 = arith.constant 0 : i32
    return %c0_i32, %c0_i32_0 : i32, i32
  }
  func.func @transform_3(%arg0: i32) -> (i32, i32) {
    %c0_i32 = arith.constant 0 : i32
    %c0_i32_0 = arith.constant 0 : i32
    %c0_i32_1 = arith.constant 0 : i32
    return %c0_i32, %c0_i32_0 : i32, i32
  }
  func.func @transform_4(%arg0: i32) -> (i32, i32) {
    %c0_i32 = arith.constant 0 : i32
    %c0_i32_0 = arith.constant 0 : i32
    %c0_i32_1 = arith.constant 0 : i32
    return %c0_i32, %c0_i32_0 : i32, i32
  }
  func.func @transform_5(%arg0: i32) -> (i32, i32) {
    %c0_i32 = arith.constant 0 : i32
    %c0_i32_0 = arith.constant 0 : i32
    %c0_i32_1 = arith.constant 0 : i32
    return %c0_i32, %c0_i32_0 : i32, i32
  }
  func.func @transform_6(%arg0: i32) -> (i32, i32) {
    %c0_i32 = arith.constant 0 : i32
    %c0_i32_0 = arith.constant 0 : i32
    %c0_i32_1 = arith.constant 0 : i32
    return %c0_i32, %c0_i32_0 : i32, i32
  }
}

</mosaic_0001>

<bundles_post_ra>
// kernel: _lambda_.6
= control target key start
LH: loop header
LB: loop body
LE: loop exit
PB: predicated region body
PF: predicated region fallthrough
CT: control target
= control target key end

     0   :  { %s802_s12 = smov 0   ;;  %s804_s13 = smov 0   ;;  %s953_s0 = inlined_call_operand.vmem [shape: bf16[8,48], index: 0, kind: input, shape index: {}]   ;;  %s954_s1 = inlined_call_operand.vmem [shape: bf16[48,2048], index: 1, kind: input, shape index: {}]   ;;  %s955_s2 = inlined_call_operand.vmem [shape: f32[8,1], index: 2, kind: input, shape index: {}]   ;;  %s956_s3 = inlined_call_operand.vmem [shape: bf16[8,2048], index: 3, kind: output, shape index: {}]  }
   0x1   :  { %s806_s14 = smov 0  }
   0x2 LB: > { %s681_s15 = sadd.s32 4294967295, %s779_s14   ;;  %s819_s16 = sadd.s32 1, %s779_s14   ;;  %s779_s14 = sphi %s806_s14, %s959_s14   ;;  %s775_s13 = sphi %s804_s13, %s958_s13   ;;  %s771_s12 = sphi %s802_s12, %s957_s12  }
   0x3   : > { %s38_s17 = ssub.s32 %s779_s14, %s819_s16  ;;  %s41_s18 = sadd.s32 1, %s775_s13 }
   0x4   : > { %p39_p0 = scmp.eq.s32.totalorder %s38_s17, 0  ;;  %p48_p1 = scmp.ne.s32.totalorder %s775_s13, %s771_s12 }
   0x5   : > { %p49_p2 = scmp.eq.s32.totalorder %s779_s14, 0  ;;  %p684_p4 = scmp.ge.s32.totalorder %s779_s14, 2 }
   0x6   : > { %s828_s19 = scalar_select %p39_p0, %s775_s13, %s41_s18  }
   0x7   : > { %p50_p3 = por %p49_p2, %p48_p1  ;;  %127 = sbr.rel (%p684_p4) target bundleno = 29 (0x1d), region = 24 }
   0xc   : > { %130 = sbr.rel (!%p50_p3) target bundleno = 29 (0x1d), region = 28  ;;  %s132_s20 = sand.u32 (%p50_p3), 1, %s775_s13  }
   0xd   : > { %s724_s21 = sshll.u32 (%p50_p3), %s779_s14, 5  ;;  %s729_s22 = smul.u32 (%p50_p3), 192, %s132_s20 }
   0xe   : > { %s836_s25 = scalar_lea.vmem (%p50_p3), %s954_s1, %s724_s21 }
   0xf   : > { %v150_v0 = vld [vmem:[%s836_s25] sm:$0xff] (%p50_p3)  ;;  %v152_v1 = vld [vmem:[%s836_s25 + $0x8] sm:$0xff] (%p50_p3)  ;;  %v154_v2 = vld [vmem:[%s836_s25 + $0x10] sm:$0xff] (%p50_p3)  ;;  %s844_s26 = scalar_lea.vmem (%p50_p3), [#allocation2], %s729_s22 }
  0x10   : > { %v156_v3 = vld [vmem:[%s836_s25 + $0x18] sm:$0xff] (%p50_p3)  ;;  %v158_v4 = vld [vmem:[%s836_s25 + $0x40] sm:$0xff] (%p50_p3)  ;;  %v160_v5 = vld [vmem:[%s836_s25 + $0x48] sm:$0xff] (%p50_p3)  ;;  %151 = vst [vmem:[%s844_s26] sm:$0xff] (%p50_p3), %v150_v0 }
  0x11   : > { %153 = vst [vmem:[%s844_s26 + $0x8] sm:$0xff] %v152_v1  ;;  %155 = vst [vmem:[%s844_s26 + $0x10] sm:$0xff] %v154_v2  ;;  %v162_v6 = vld [vmem:[%s836_s25 + $0x50] sm:$0xff]  ;;  %v164_v7 = vld [vmem:[%s836_s25 + $0x58] sm:$0xff] }
  0x12   : > { %157 = vst [vmem:[%s844_s26 + $0x18] sm:$0xff] %v156_v3  ;;  %159 = vst [vmem:[%s844_s26 + $0x20] sm:$0xff] %v158_v4  ;;  %v166_v8 = vld [vmem:[%s836_s25 + $0x80] sm:$0xff]  ;;  %v168_v9 = vld [vmem:[%s836_s25 + $0x88] sm:$0xff] }
  0x13   : > { %161 = vst [vmem:[%s844_s26 + $0x28] sm:$0xff] %v160_v5  ;;  %163 = vst [vmem:[%s844_s26 + $0x30] sm:$0xff] %v162_v6  ;;  %v170_v10 = vld [vmem:[%s836_s25 + $0x90] sm:$0xff]  ;;  %v172_v11 = vld [vmem:[%s836_s25 + $0x98] sm:$0xff] }
  0x14   : > { %165 = vst [vmem:[%s844_s26 + $0x38] sm:$0xff] %v164_v7  ;;  %167 = vst [vmem:[%s844_s26 + $0x40] sm:$0xff] %v166_v8  ;;  %v174_v12 = vld [vmem:[%s836_s25 + $0xc0] sm:$0xff]  ;;  %v176_v13 = vld [vmem:[%s836_s25 + $0xc8] sm:$0xff] }
  0x15   : > { %169 = vst [vmem:[%s844_s26 + $0x48] sm:$0xff] %v168_v9  ;;  %171 = vst [vmem:[%s844_s26 + $0x50] sm:$0xff] %v170_v10  ;;  %v178_v14 = vld [vmem:[%s836_s25 + $0xd0] sm:$0xff]  ;;  %v180_v15 = vld [vmem:[%s836_s25 + $0xd8] sm:$0xff] }
  0x16   : > { %173 = vst [vmem:[%s844_s26 + $0x58] sm:$0xff] %v172_v11  ;;  %175 = vst [vmem:[%s844_s26 + $0x60] sm:$0xff] %v174_v12  ;;  %v182_v16 = vld [vmem:[%s836_s25 + $0x100] sm:$0xff]  ;;  %v184_v17 = vld [vmem:[%s836_s25 + $0x108] sm:$0xff] }
  0x17   : > { %177 = vst [vmem:[%s844_s26 + $0x68] sm:$0xff] %v176_v13  ;;  %179 = vst [vmem:[%s844_s26 + $0x70] sm:$0xff] %v178_v14  ;;  %v186_v18 = vld [vmem:[%s836_s25 + $0x110] sm:$0xff]  ;;  %v188_v19 = vld [vmem:[%s836_s25 + $0x118] sm:$0xff] }
  0x18   : > { %181 = vst [vmem:[%s844_s26 + $0x78] sm:$0xff] %v180_v15  ;;  %183 = vst [vmem:[%s844_s26 + $0x80] sm:$0xff] %v182_v16  ;;  %v190_v20 = vld [vmem:[%s836_s25 + $0x140] sm:$0xff]  ;;  %v192_v21 = vld [vmem:[%s836_s25 + $0x148] sm:$0xff] }
  0x19   : > { %185 = vst [vmem:[%s844_s26 + $0x88] sm:$0xff] %v184_v17  ;;  %187 = vst [vmem:[%s844_s26 + $0x90] sm:$0xff] %v186_v18  ;;  %v194_v22 = vld [vmem:[%s836_s25 + $0x150] sm:$0xff]  ;;  %v196_v23 = vld [vmem:[%s836_s25 + $0x158] sm:$0xff] }
  0x1a   : > { %189 = vst [vmem:[%s844_s26 + $0x98] sm:$0xff] %v188_v19  ;;  %191 = vst [vmem:[%s844_s26 + $0xa0] sm:$0xff] %v190_v20 }
  0x1b   : > { %193 = vst [vmem:[%s844_s26 + $0xa8] sm:$0xff] %v192_v21  ;;  %195 = vst [vmem:[%s844_s26 + $0xb0] sm:$0xff] %v194_v22 }
  0x1c   : > { %197 = vst [vmem:[%s844_s26 + $0xb8] sm:$0xff] %v196_v23 }
  0x1d PF: > { %p687_p5 = scmp.ge.s32.totalorder %s779_s14, 1  ;;  %p202_p6 = scmp.lt.s32.totalorder %s779_s14, 3 }
  0x1f   : > { %p203_p7 = pnand %p687_p5, %p202_p6 }
  0x20   : > { %s209_s27 = sand.u32 (!%p203_p7), 1, %s771_s12   ;;  %s688_s7 = sshll.u32 (!%p203_p7), %s681_s15, 3 }
  0x21   : > { %206 = sbr.rel (%p203_p7) target bundleno = 270 (0x10e), region = 51  ;;  %p234_p8 = scmp.lt.s32.totalorder (!%p203_p7), %s688_s7, 15 }
  0x22   : > { %s730_s30 = smul.u32 (!%p203_p7), 192, %s209_s27 }
  0x24   : > { %s897_s4 = scalar_lea.vmem (!%p203_p7), [#allocation2], %s730_s30 }
  0x26   : > { %v265_v24 = vld [vmem:[%s955_s2] sm:$0xff]  ;;  %v781_v25 = vmov 0   ;;  %v258_v28 = vld [vmem:[%s897_s4 + $0x88] sm:$0xff]  ;;  %v259_v48 = vld [vmem:[%s897_s4 + $0x90] sm:$0xff]  ;;  %vm391_vm0 = vcmask 392192   ;;  %s961_s7 = smov (!%p234_p8, %s688_s7), 15 }
  0x27   : > { %427 = vmatprep.mubr.bf16.mxu0 %v781_v25  ;;  %468 = vmatprep.mubr.bf16.mxu1 %v781_v25  ;;  %v257_v26 = vld [vmem:[%s897_s4 + $0x80] sm:$0xff]  ;;  %v262_v30 = vld [vmem:[%s897_s4 + $0xa8] sm:$0xff]  ;;  %v263_v49 = vld [vmem:[%s897_s4 + $0xb0] sm:$0xff]  ;;  %s689_s8 = sshll.u32 %s961_s7, 2 }
  0x28   : > { %756 = vset.pattern.permute.xlu0 %v781_v25  ;;  %v261_v27 = vld [vmem:[%s897_s4 + $0xa0] sm:$0xff]  ;;  %v709_v34 = vcombine.high %v258_v28, %v262_v30  ;;  %v708_v35 = vcombine.low %v258_v28, %v262_v30  ;;  %v250_v37 = vld [vmem:[%s897_s4 + $0x48] sm:$0xff]  ;;  %v260_v50 = vld [vmem:[%s897_s4 + $0x98] sm:$0xff]  ;;  %v711_v54 = vcombine.high %v259_v48, %v263_v49  ;;  %v710_v61 = vcombine.low %v259_v48, %v263_v49  ;;  %s937_s11 = scalar_lea.vmem %s956_s3, %s689_s8 }
  0x29   : > { %268 = vperm.xlu0 %756, %v265_v24   ;;  %v707_v29 = vcombine.high %v257_v26, %v261_v27  ;;  %v706_v31 = vcombine.low %v257_v26, %v261_v27  ;;  %v249_v32 = vld [vmem:[%s897_s4 + $0x40] sm:$0xff]  ;;  %v254_v38 = vld [vmem:[%s897_s4 + $0x68] sm:$0xff]  ;;  %v264_v51 = vld [vmem:[%s897_s4 + $0xb8] sm:$0xff] }
  0x2a   : > { %v253_v33 = vld [vmem:[%s897_s4 + $0x60] sm:$0xff]  ;;  %v701_v40 = vcombine.high %v250_v37, %v254_v38  ;;  %v242_v42 = vld [vmem:[%s897_s4 + $0x8] sm:$0xff]  ;;  %446 = vmatprep.subr.bf16.mxu1 %v709_v34  ;;  %v700_v45 = vcombine.low %v250_v37, %v254_v38  ;;  %v713_v55 = vcombine.high %v260_v50, %v264_v51  ;;  %v251_v56 = vld [vmem:[%s897_s4 + $0x50] sm:$0xff]  ;;  %v712_v62 = vcombine.low %v260_v50, %v264_v51 }
  0x2b   : > { %v699_v36 = vcombine.high %v249_v32, %v253_v33  ;;  %v241_v39 = vld [vmem:[%s897_s4] sm:$0xff]  ;;  %405 = vmatprep.subr.bf16.mxu0 %v707_v29  ;;  %v246_v43 = vld [vmem:[%s897_s4 + $0x28] sm:$0xff]  ;;  %v698_v44 = vcombine.low %v249_v32, %v253_v33  ;;  %447 = vmatpush1.bf16.msra.mxu1 %v708_v35  ;;  %v255_v57 = vld [vmem:[%s897_s4 + $0x70] sm:$0xff] }
  0x2c   : > { %v245_v41 = vld [vmem:[%s897_s4 + $0x20] sm:$0xff]  ;;  %406 = vmatpush1.bf16.msra.mxu0 %v706_v31  ;;  %448 = vmatprep.subr.bf16.mxu1 %v701_v40  ;;  %v693_v47 = vcombine.high %v242_v42, %v246_v43  ;;  %v692_v53 = vcombine.low %v242_v42, %v246_v43  ;;  %v252_v58 = vld [vmem:[%s897_s4 + $0x58] sm:$0xff]  ;;  %v703_v63 = vcombine.high %v251_v56, %v255_v57  ;;  %v243_v1 = vld [vmem:[%s897_s4 + $0x10] sm:$0xff] }
  0x2d   : > { %407 = vmatprep.subr.bf16.mxu0 %v699_v36  ;;  %v691_v46 = vcombine.high %v241_v39, %v245_v41  ;;  %v690_v52 = vcombine.low %v241_v39, %v245_v41  ;;  %v256_v59 = vld [vmem:[%s897_s4 + $0x78] sm:$0xff]  ;;  %v240_v60 = vld [vmem:[%s953_s0] sm:$0xf]  ;;  %v247_v2 = vld [vmem:[%s897_s4 + $0x30] sm:$0xff]  ;;  %v702_v5 = vcombine.low %v251_v56, %v255_v57 }
  0x2e   : > { %v705_v0 = vcombine.high %v252_v58, %v256_v59  ;;  %v244_v3 = vld [vmem:[%s897_s4 + $0x18] sm:$0xff]  ;;  %v704_v6 = vcombine.low %v252_v58, %v256_v59  ;;  %v695_v7 = vcombine.high %v243_v1, %v247_v2  ;;  %v694_v9 = vcombine.low %v243_v1, %v247_v2 }
  0x2f   : > { %449 = vmatpush1.bf16.msra.mxu1 %v700_v45  ;;  %v248_v4 = vld [vmem:[%s897_s4 + $0x38] sm:$0xff] }
  0x30   : > { %408 = vmatpush1.bf16.msra.mxu0 %v698_v44  ;;  %450 = vmatprep.subr.bf16.mxu1 %v693_v47  ;;  %v697_v8 = vcombine.high %v244_v3, %v248_v4  ;;  %v696_v10 = vcombine.low %v244_v3, %v248_v4 }
  0x31   : > { %409 = vmatprep.subr.bf16.mxu0 %v691_v46 }
  0x33   : > { %451 = vmatpush1.bf16.msra.mxu1 %v692_v53 }
  0x34   : > { %410 = vmatpush1.bf16.msra.mxu0 %v690_v52  ;;  %528 = vmatprep.subr.bf16.mxu1 %v713_v55 }
  0x35   : > { %487 = vmatprep.subr.bf16.mxu0 %v711_v54 }
  0x36   : > { %715 = vmatmul.mubr.msk.bf16.vlgmr.msra.gmra.mxu1 %vm391_vm0, %v240_v60 }
  0x37   : > { %714 = vmatmul.mubr.msk.bf16.vlgmr.msra.gmra.mxu0 %vm391_vm0, %v240_v60  ;;  %529 = vmatpush1.bf16.msra.mxu1 %v712_v62 }
  0x38   : > { %488 = vmatpush1.bf16.msra.mxu0 %v710_v61  ;;  %530 = vmatprep.subr.bf16.mxu1 %v705_v0 }
  0x39   : > { %489 = vmatprep.subr.bf16.mxu0 %v703_v63  ;;  %509 = vmatprep.mubr.bf16.mxu0 %v781_v25 }
  0x3a   : > { %550 = vmatprep.mubr.bf16.mxu1 %v781_v25 }
  0x3b   : > { %531 = vmatpush1.bf16.msra.mxu1 %v704_v6 }
  0x3c   : > { %490 = vmatpush1.bf16.msra.mxu0 %v702_v5  ;;  %532 = vmatprep.subr.bf16.mxu1 %v697_v8 }
  0x3d   : > { %491 = vmatprep.subr.bf16.mxu0 %v695_v7 }
  0x3f   : > { %533 = vmatpush1.bf16.msra.mxu1 %v696_v10 }
  0x40   : > { %492 = vmatpush1.bf16.msra.mxu0 %v694_v9 }
  0x42   : > { %717 = vmatmul.mubr.msk.bf16.vlgmr.msra.gmra.mxu1 %vm391_vm0, %v240_v60 }
  0x43   : > { %716 = vmatmul.mubr.msk.bf16.vlgmr.msra.gmra.mxu0 %vm391_vm0, %v240_v60 }
  0xa4   : > { %v269_v11 = vpop.permute.xlu0 %268 }
  0xf6   : > { %v470_v14 = vpop.f32.mrf.mxu1 }
  0xf7   : > { %v429_v12 = vpop.f32.mrf.mxu0  ;;  %v471_v15 = vadd.f32 %v470_v14, %v269_v11 }
  0xf8   : > { %v430_v13 = vadd.f32 %v429_v12, %v269_v11  ;;  %v472_v19 = vpop.f32.mrf.mxu1 }
  0xf9   : > { %v431_v16 = vpop.f32.mrf.mxu0  ;;  %v569_v20 = vmul.f32 0.2, %v471_v15  ;;  %v473_v21 = vadd.f32 %v472_v19, %v269_v11  ;;  %vm561_vm2 = vcmp.gt.f32.partialorder %v471_v15, 0.0 }
  0xfa   : > { %v567_v17 = vmul.f32 0.2, %v430_v13  ;;  %v432_v18 = vadd.f32 %v431_v16, %v269_v11  ;;  %vm559_vm1 = vcmp.gt.f32.partialorder %v430_v13, 0.0  ;;  %v474_v24 = vpop.f32.mrf.mxu1 }
  0xfb   : > { %v433_v22 = vpop.f32.mrf.mxu0  ;;  %vm562_vm4 = vcmp.gt.f32.partialorder %v473_v21, 0.0  ;;  %v570_v25 = vmul.f32 0.2, %v473_v21  ;;  %v577_v30 = vsel %vm561_vm2, %v471_v15, %v569_v20 }
  0xfc   : > { %vm560_vm3 = vcmp.gt.f32.partialorder %v432_v18, 0.0  ;;  %v568_v23 = vmul.f32 0.2, %v432_v18  ;;  %v575_v27 = vsel %vm559_vm1, %v430_v13, %v567_v17  ;;  %v475_v29 = vpop.f32.mrf.mxu1 }
  0xfd   : > { %v434_v26 = vpop.f32.mrf.mxu0  ;;  %v578_v32 = vsel %vm562_vm4, %v473_v21, %v570_v25 }
  0xfe   : > { %v576_v28 = vsel %vm560_vm3, %v432_v18, %v568_v23  ;;  %v726_v33 = vpack.c.bf16 %v578_v32, %v577_v30 }
  0xff   : > { %v725_v31 = vpack.c.bf16 %v576_v28, %v575_v27 }
 0x100   : > { %616 = vst [vmem:[%s937_s11 + $0x8] sm:$0xff] %v726_v33 }
 0x101   : > { %615 = vst [vmem:[%s937_s11] sm:$0xff] %v725_v31 }
 0x102   : > { %v552_v36 = vpop.f32.mrf.mxu1 }
 0x103   : > { %v511_v34 = vpop.f32.mrf.mxu0  ;;  %v553_v37 = vadd.f32 %v552_v36, %v269_v11 }
 0x104   : > { %v512_v35 = vadd.f32 %v511_v34, %v269_v11  ;;  %v554_v41 = vpop.f32.mrf.mxu1 }
 0x105   : > { %v513_v38 = vpop.f32.mrf.mxu0  ;;  %v573_v42 = vmul.f32 0.2, %v553_v37  ;;  %v555_v43 = vadd.f32 %v554_v41, %v269_v11  ;;  %vm565_vm6 = vcmp.gt.f32.partialorder %v553_v37, 0.0 }
 0x106   : > { %v571_v39 = vmul.f32 0.2, %v512_v35  ;;  %v514_v40 = vadd.f32 %v513_v38, %v269_v11  ;;  %vm563_vm5 = vcmp.gt.f32.partialorder %v512_v35, 0.0  ;;  %v556_v46 = vpop.f32.mrf.mxu1 }
 0x107   : > { %v515_v44 = vpop.f32.mrf.mxu0  ;;  %vm566_vm8 = vcmp.gt.f32.partialorder %v555_v43, 0.0  ;;  %v574_v47 = vmul.f32 0.2, %v555_v43  ;;  %v581_v52 = vsel %vm565_vm6, %v553_v37, %v573_v42 }
 0x108   : > { %vm564_vm7 = vcmp.gt.f32.partialorder %v514_v40, 0.0  ;;  %v572_v45 = vmul.f32 0.2, %v514_v40  ;;  %v579_v49 = vsel %vm563_vm5, %v512_v35, %v571_v39  ;;  %v557_v51 = vpop.f32.mrf.mxu1 }
 0x109   : > { %v516_v48 = vpop.f32.mrf.mxu0  ;;  %v582_v54 = vsel %vm566_vm8, %v555_v43, %v574_v47 }
 0x10a   : > { %v580_v50 = vsel %vm564_vm7, %v514_v40, %v572_v45  ;;  %v728_v55 = vpack.c.bf16 %v582_v54, %v581_v52 }
 0x10b   : > { %v727_v53 = vpack.c.bf16 %v580_v50, %v579_v49 }
 0x10c   : > { %618 = vst [vmem:[%s937_s11 + $0x18] sm:$0xff] %v728_v55 }
 0x10d   : > { %617 = vst [vmem:[%s937_s11 + $0x10] sm:$0xff] %v727_v53 }
 0x10e PF: > { %p10_p9 = scmp.ge.s32.totalorder %s819_s16, 4   ;;  %s957_s12 = smov %s775_s13 }
 0x10f   : > { %s958_s13 = smov %s828_s19  ;;  %s959_s14 = smov %s819_s16 }
 0x110   :  { %12 = sbr.rel (!%p10_p9) target bundleno = 2 (0x2), region = 90 }

// kernel: _lambda_.7
= control target key start
LH: loop header
LB: loop body
LE: loop exit
PB: predicated region body
PF: predicated region fallthrough
CT: control target
= control target key end

     0   :  { %v461_v1 = vmov 0   ;;  %s599_s1 = inlined_call_operand.vmem [shape: bf16[128,512], index: 1, kind: input, shape index: {}]   ;;  %s600_s2 = inlined_call_operand.vmem [shape: f32[16,1], index: 2, kind: input, shape index: {}]   ;;  %s601_s0 = inlined_call_operand.vmem [shape: bf16[16,128], index: 0, kind: input, shape index: {}]   ;;  %s602_s3 = inlined_call_operand.vmem [shape: bf16[16,512], index: 3, kind: output, shape index: {}]  }
   0x1   :  { %v412_v0 = vld [vmem:[%s599_s1 + $0xe4] ss:$16 sps:$4 sm:$0xff]   ;;  %259 = vmatprep.mubr.bf16.mxu0 %v461_v1  ;;  %302 = vmatprep.mubr.bf16.mxu1 %v461_v1  ;;  %v414_v2 = vld [vmem:[%s599_s1 + $0xec] ss:$16 sps:$4 sm:$0xff]   ;;  %v416_v3 = vld [vmem:[%s599_s1 + $0xe0] ss:$16 sps:$4 sm:$0xff]  }
   0x2   :  { %411 = vset.pattern.permute.xlu0 %v461_v1  ;;  %227 = vmatprep.subr.bf16.mxu0 %v412_v0  ;;  %v417_v4 = vld [vmem:[%s599_s1 + $0xe8] ss:$16 sps:$4 sm:$0xff]   ;;  %v418_v5 = vld [vmem:[%s599_s1 + $0xc4] ss:$16 sps:$4 sm:$0xff]   ;;  %v420_v6 = vld [vmem:[%s599_s1 + $0xcc] ss:$16 sps:$4 sm:$0xff]  }
   0x3   :  { %270 = vmatprep.subr.bf16.mxu1 %v414_v2  ;;  %228 = vmatpush1.bf16.msra.mxu0 %v416_v3  ;;  %v422_v7 = vld [vmem:[%s599_s1 + $0xc0] ss:$16 sps:$4 sm:$0xff]   ;;  %v423_v8 = vld [vmem:[%s599_s1 + $0xc8] ss:$16 sps:$4 sm:$0xff]   ;;  %v424_v9 = vld [vmem:[%s599_s1 + $0xa4] ss:$16 sps:$4 sm:$0xff]  }
   0x4   :  { %271 = vmatpush1.bf16.msra.mxu1 %v417_v4  ;;  %229 = vmatprep.subr.bf16.mxu0 %v418_v5  ;;  %v426_v10 = vld [vmem:[%s599_s1 + $0xac] ss:$16 sps:$4 sm:$0xff]   ;;  %v428_v11 = vld [vmem:[%s599_s1 + $0xa0] ss:$16 sps:$4 sm:$0xff]   ;;  %v429_v12 = vld [vmem:[%s599_s1 + $0xa8] ss:$16 sps:$4 sm:$0xff]  }
   0x5   :  { %272 = vmatprep.subr.bf16.mxu1 %v420_v6  ;;  %v430_v13 = vld [vmem:[%s599_s1 + $0x84] ss:$16 sps:$4 sm:$0xff]   ;;  %v432_v14 = vld [vmem:[%s599_s1 + $0x8c] ss:$16 sps:$4 sm:$0xff]   ;;  %v434_v15 = vld [vmem:[%s599_s1 + $0x80] ss:$16 sps:$4 sm:$0xff]  }
   0x6   :  { %v435_v16 = vld [vmem:[%s599_s1 + $0x88] ss:$16 sps:$4 sm:$0xff]   ;;  %v436_v17 = vld [vmem:[%s599_s1 + $0x64] ss:$16 sps:$4 sm:$0xff]   ;;  %v438_v18 = vld [vmem:[%s599_s1 + $0x6c] ss:$16 sps:$4 sm:$0xff]  }
   0x7   :  { %230 = vmatpush1.bf16.msra.mxu0 %v422_v7  ;;  %v440_v19 = vld [vmem:[%s599_s1 + $0x60] ss:$16 sps:$4 sm:$0xff]   ;;  %v441_v20 = vld [vmem:[%s599_s1 + $0x68] ss:$16 sps:$4 sm:$0xff]   ;;  %v442_v21 = vld [vmem:[%s599_s1 + $0x44] ss:$16 sps:$4 sm:$0xff]  }
   0x8   :  { %273 = vmatpush1.bf16.msra.mxu1 %v423_v8  ;;  %231 = vmatprep.subr.bf16.mxu0 %v424_v9  ;;  %v444_v22 = vld [vmem:[%s599_s1 + $0x4c] ss:$16 sps:$4 sm:$0xff]   ;;  %v446_v23 = vld [vmem:[%s599_s1 + $0x40] ss:$16 sps:$4 sm:$0xff]   ;;  %v447_v24 = vld [vmem:[%s599_s1 + $0x48] ss:$16 sps:$4 sm:$0xff]  }
   0x9   :  { %274 = vmatprep.subr.bf16.mxu1 %v426_v10  ;;  %v448_v25 = vld [vmem:[%s599_s1 + $0x24] ss:$16 sps:$4 sm:$0xff]   ;;  %v450_v26 = vld [vmem:[%s599_s1 + $0x2c] ss:$16 sps:$4 sm:$0xff]   ;;  %v452_v28 = vld [vmem:[%s599_s1 + $0x20] ss:$16 sps:$4 sm:$0xff]  }
   0xa   :  { %v49_v27 = vld [vmem:[%s600_s2] sm:$0xff]  ;;  %v453_v29 = vld [vmem:[%s599_s1 + $0x28] ss:$16 sps:$4 sm:$0xff]   ;;  %v456_v32 = vld [vmem:[%s599_s1 + $0xc] ss:$16 sps:$4 sm:$0xff]  }
   0xb   :  { %232 = vmatpush1.bf16.msra.mxu0 %v428_v11  ;;  %53 = vperm.xlu0 %411, %v49_v27   ;;  %v50_v30 = vld [vmem:[%s600_s2 + $0x8] sm:$0xff]  ;;  %v454_v31 = vld [vmem:[%s599_s1 + $0x4] ss:$16 sps:$4 sm:$0xff]   ;;  %v458_v33 = vld [vmem:[%s599_s1] ss:$16 sps:$4 sm:$0xff]  }
   0xc   :  { %275 = vmatpush1.bf16.msra.mxu1 %v429_v12  ;;  %233 = vmatprep.subr.bf16.mxu0 %v430_v13  ;;  %v459_v34 = vld [vmem:[%s599_s1 + $0x8] ss:$16 sps:$4 sm:$0xff]   ;;  %v460_v35 = vld [vmem:[%s601_s0] sm:$0xff]  }
   0xd   :  { %276 = vmatprep.subr.bf16.mxu1 %v432_v14 }
   0xf   :  { %234 = vmatpush1.bf16.msra.mxu0 %v434_v15  ;;  %58 = vperm.xlu0 %411, %v50_v30  }
  0x10   :  { %277 = vmatpush1.bf16.msra.mxu1 %v435_v16  ;;  %235 = vmatprep.subr.bf16.mxu0 %v436_v17 }
  0x11   :  { %278 = vmatprep.subr.bf16.mxu1 %v438_v18 }
  0x13   :  { %236 = vmatpush1.bf16.msra.mxu0 %v440_v19 }
  0x14   :  { %279 = vmatpush1.bf16.msra.mxu1 %v441_v20  ;;  %237 = vmatprep.subr.bf16.mxu0 %v442_v21 }
  0x15   :  { %280 = vmatprep.subr.bf16.mxu1 %v444_v22 }
  0x17   :  { %238 = vmatpush1.bf16.msra.mxu0 %v446_v23 }
  0x18   :  { %281 = vmatpush1.bf16.msra.mxu1 %v447_v24  ;;  %239 = vmatprep.subr.bf16.mxu0 %v448_v25 }
  0x19   :  { %282 = vmatprep.subr.bf16.mxu1 %v450_v26 }
  0x1b   :  { %240 = vmatpush1.bf16.msra.mxu0 %v452_v28 }
  0x1c   :  { %283 = vmatpush1.bf16.msra.mxu1 %v453_v29  ;;  %241 = vmatprep.subr.bf16.mxu0 %v454_v31 }
  0x1d   :  { %284 = vmatprep.subr.bf16.mxu1 %v456_v32 }
  0x1f   :  { %242 = vmatpush1.bf16.msra.mxu0 %v458_v33 }
  0x20   :  { %285 = vmatpush1.bf16.msra.mxu1 %v459_v34 }
  0x22   :  { %260 = vmatmul.mubr.bf16.vlgmr.msra.gmra.mxu0 %v460_v35 }
  0x23   :  { %303 = vmatmul.mubr.bf16.vlgmr.msra.gmra.mxu1 %v460_v35 }
  0x86   :  { %v54_v36 = vpop.permute.xlu0 %53 }
  0x8a   :  { %v59_v45 = vpop.permute.xlu0 %58 }
  0xe2   :  { %v261_v37 = vpop.f32.mrf.mxu0 }
  0xe3   :  { %v304_v38 = vpop.f32.mrf.mxu1  ;;  %v262_v39 = vadd.f32 %v261_v37, %v54_v36 }
  0xe4   :  { %v305_v40 = vadd.f32 %v304_v38, %v54_v36  ;;  %v263_v41 = vpop.f32.mrf.mxu0 }
  0xe5   :  { %v306_v42 = vpop.f32.mrf.mxu1  ;;  %v321_v43 = vmul.f32 0.2, %v262_v39  ;;  %vm313_vm0 = vcmp.gt.f32.partialorder %v262_v39, 0.0  ;;  %v264_v46 = vadd.f32 %v263_v41, %v54_v36 }
  0xe6   :  { %v323_v44 = vmul.f32 0.2, %v305_v40  ;;  %vm315_vm1 = vcmp.gt.f32.partialorder %v305_v40, 0.0  ;;  %v307_v47 = vadd.f32 %v306_v42, %v54_v36  ;;  %v265_v48 = vpop.f32.mrf.mxu0 }
  0xe7   :  { %v308_v49 = vpop.f32.mrf.mxu1  ;;  %v266_v50 = vadd.f32 %v265_v48, %v59_v45  ;;  %vm314_vm2 = vcmp.gt.f32.partialorder %v264_v46, 0.0  ;;  %v322_v52 = vmul.f32 0.2, %v264_v46  ;;  %v329_v56 = vsel %vm313_vm0, %v262_v39, %v321_v43 }
  0xe8   :  { %v309_v51 = vadd.f32 %v308_v49, %v59_v45  ;;  %vm316_vm3 = vcmp.gt.f32.partialorder %v307_v47, 0.0  ;;  %v324_v53 = vmul.f32 0.2, %v307_v47  ;;  %v267_v54 = vpop.f32.mrf.mxu0  ;;  %v331_v57 = vsel %vm315_vm1, %v305_v40, %v323_v44 }
  0xe9   :  { %v310_v55 = vpop.f32.mrf.mxu1  ;;  %v325_v58 = vmul.f32 0.2, %v266_v50  ;;  %v330_v60 = vsel %vm314_vm2, %v264_v46, %v322_v52  ;;  %v268_v62 = vadd.f32 %v267_v54, %v59_v45  ;;  %vm317_vm4 = vcmp.gt.f32.partialorder %v266_v50, 0.0 }
  0xea   :  { %v327_v59 = vmul.f32 0.2, %v309_v51  ;;  %v332_v61 = vsel %vm316_vm3, %v307_v47, %v324_v53  ;;  %v311_v63 = vadd.f32 %v310_v55, %v59_v45  ;;  %v406_v0 = vpack.c.bf16 %v330_v60, %v329_v56 }
  0xeb   :  { %v407_v1 = vpack.c.bf16 %v332_v61, %v331_v57  ;;  %vm319_vm5 = vcmp.gt.f32.partialorder %v309_v51, 0.0  ;;  %vm318_vm6 = vcmp.gt.f32.partialorder %v268_v62, 0.0  ;;  %v326_v2 = vmul.f32 0.2, %v268_v62 }
  0xec   :  { %vm320_vm7 = vcmp.gt.f32.partialorder %v311_v63, 0.0  ;;  %v328_v3 = vmul.f32 0.2, %v311_v63  ;;  %361 = vst [vmem:[%s602_s3] sm:$0xff] %v406_v0  ;;  %v333_v4 = vsel %vm317_vm4, %v266_v50, %v325_v58  ;;  %v335_v5 = vsel %vm319_vm5, %v309_v51, %v327_v59 }
  0xed   :  { %362 = vst [vmem:[%s602_s3 + $0x8] sm:$0xff] %v407_v1  ;;  %v334_v6 = vsel %vm318_vm6, %v268_v62, %v326_v2 }
  0xee   :  { %v336_v7 = vsel %vm320_vm7, %v311_v63, %v328_v3  ;;  %v408_v8 = vpack.c.bf16 %v334_v6, %v333_v4 }
  0xef   :  { %v409_v9 = vpack.c.bf16 %v336_v7, %v335_v5 }
  0xf0   :  { %363 = vst [vmem:[%s602_s3 + $0x10] sm:$0xff] %v408_v8 }
  0xf1   :  { %364 = vst [vmem:[%s602_s3 + $0x18] sm:$0xff] %v409_v9 }

// kernel: _lambda_.8
= control target key start
LH: loop header
LB: loop body
LE: loop exit
PB: predicated region body
PF: predicated region fallthrough
CT: control target
= control target key end

     0   :  { %v384_v1 = vmov 0   ;;  %s483_s1 = inlined_call_operand.vmem [shape: bf16[256,128], index: 1, kind: input, shape index: {}]   ;;  %s484_s0 = inlined_call_operand.vmem [shape: bf16[32,256], index: 0, kind: input, shape index: {}]   ;;  %s485_s2 = inlined_call_operand.vmem [shape: f32[32,1], index: 2, kind: input, shape index: {}]   ;;  %s486_s3 = inlined_call_operand.vmem [shape: bf16[32,128], index: 3, kind: output, shape index: {}]  }
   0x1   :  { %v362_v0 = vld [vmem:[%s483_s1 + $0x78] sm:$0xff]   ;;  %361 = vset.pattern.permute.xlu1 %v384_v1  ;;  %360 = vset.pattern.permute.xlu0 %v384_v1  ;;  %v364_v3 = vld [vmem:[%s483_s1 + $0x70] sm:$0xff]   ;;  %v366_v5 = vld [vmem:[%s483_s1 + $0x68] sm:$0xff]  }
   0x2   :  { %v363_v2 = vld [vmem:[%s483_s1 + $0x38] sm:$0xff]   ;;  %315 = vmatprep.subr.bf16.mxu0 %v362_v0  ;;  %343 = vmatprep.subr.bf16.mxu1 %v362_v0  ;;  %v365_v4 = vld [vmem:[%s483_s1 + $0x30] sm:$0xff]   ;;  %v367_v6 = vld [vmem:[%s483_s1 + $0x28] sm:$0xff]  }
   0x3   :  { %316 = vmatpush3.bf16.msra.mxu0 %v363_v2  ;;  %351 = vmatpush3.bf16.msra.mxu1 %v363_v2  ;;  %v368_v7 = vld [vmem:[%s483_s1 + $0x60] sm:$0xff]   ;;  %v370_v9 = vld [vmem:[%s483_s1 + $0x58] sm:$0xff]   ;;  %v372_v11 = vld [vmem:[%s483_s1 + $0x50] sm:$0xff]  }
   0x4   :  { %317 = vmatprep.subr.bf16.mxu0 %v364_v3  ;;  %344 = vmatprep.subr.bf16.mxu1 %v364_v3  ;;  %v369_v8 = vld [vmem:[%s483_s1 + $0x20] sm:$0xff]   ;;  %v371_v10 = vld [vmem:[%s483_s1 + $0x18] sm:$0xff]   ;;  %v373_v14 = vld [vmem:[%s483_s1 + $0x10] sm:$0xff]  }
   0x5   :  { %v380_v12 = vld [vmem:[%s484_s0 + $0x4] ss:$8 sps:$4 sm:$0xff]   ;;  %v383_v13 = vld [vmem:[%s484_s0 + $0x14] ss:$8 sps:$4 sm:$0xff]   ;;  %v378_v23 = vld [vmem:[%s484_s0] ss:$8 sps:$4 sm:$0xff]  }
   0x6   :  { %v53_v15 = vld [vmem:[%s485_s2 + $0x10] sm:$0xff]  ;;  %v51_v16 = vld [vmem:[%s485_s2] sm:$0xff]  ;;  %v374_v17 = vld [vmem:[%s483_s1 + $0x48] sm:$0xff]   ;;  %223 = vmatprep.mubr.bf16.mxu0 %v380_v12  ;;  %231 = vmatprep.mubr.bf16.mxu1 %v383_v13 }
   0x7   :  { %318 = vmatpush3.bf16.msra.mxu0 %v365_v4  ;;  %352 = vmatpush3.bf16.msra.mxu1 %v365_v4  ;;  %v375_v18 = vld [vmem:[%s483_s1 + $0x8] sm:$0xff]   ;;  %v54_v19 = vld [vmem:[%s485_s2 + $0x18] sm:$0xff]  ;;  %v376_v21 = vld [vmem:[%s483_s1 + $0x40] sm:$0xff]  }
   0x8   :  { %319 = vmatprep.subr.bf16.mxu0 %v366_v5  ;;  %345 = vmatprep.subr.bf16.mxu1 %v366_v5  ;;  %v52_v20 = vld [vmem:[%s485_s2 + $0x8] sm:$0xff]  ;;  %v377_v22 = vld [vmem:[%s483_s1] sm:$0xff]   ;;  %v381_v24 = vld [vmem:[%s484_s0 + $0x10] ss:$8 sps:$4 sm:$0xff]  }
   0x9   :  { %67 = vperm.xlu1 %361, %v53_v15   ;;  %57 = vperm.xlu0 %360, %v51_v16  }
   0xb   :  { %320 = vmatpush3.bf16.msra.mxu0 %v367_v6  ;;  %353 = vmatpush3.bf16.msra.mxu1 %v367_v6 }
   0xc   :  { %321 = vmatprep.subr.bf16.mxu0 %v368_v7  ;;  %346 = vmatprep.subr.bf16.mxu1 %v368_v7 }
   0xd   :  { %72 = vperm.xlu1 %361, %v54_v19   ;;  %62 = vperm.xlu0 %360, %v52_v20  }
   0xf   :  { %322 = vmatpush3.bf16.msra.mxu0 %v369_v8  ;;  %354 = vmatpush3.bf16.msra.mxu1 %v369_v8 }
  0x10   :  { %323 = vmatprep.subr.bf16.mxu0 %v370_v9  ;;  %347 = vmatprep.subr.bf16.mxu1 %v370_v9 }
  0x13   :  { %324 = vmatpush3.bf16.msra.mxu0 %v371_v10  ;;  %355 = vmatpush3.bf16.msra.mxu1 %v371_v10 }
  0x14   :  { %325 = vmatprep.subr.bf16.mxu0 %v372_v11  ;;  %348 = vmatprep.subr.bf16.mxu1 %v372_v11 }
  0x17   :  { %326 = vmatpush3.bf16.msra.mxu0 %v373_v14  ;;  %356 = vmatpush3.bf16.msra.mxu1 %v373_v14 }
  0x18   :  { %327 = vmatprep.subr.bf16.mxu0 %v374_v17  ;;  %349 = vmatprep.subr.bf16.mxu1 %v374_v17 }
  0x1b   :  { %328 = vmatpush3.bf16.msra.mxu0 %v375_v18  ;;  %357 = vmatpush3.bf16.msra.mxu1 %v375_v18 }
  0x1c   :  { %329 = vmatprep.subr.bf16.mxu0 %v376_v21  ;;  %350 = vmatprep.subr.bf16.mxu1 %v376_v21 }
  0x1f   :  { %330 = vmatpush3.bf16.msra.mxu0 %v377_v22  ;;  %358 = vmatpush3.bf16.msra.mxu1 %v377_v22 }
  0x22   :  { %224 = vmatmul.mubr.bf16.vlgmr.msra.gmra.mxu0 %v378_v23  ;;  %232 = vmatmul.mubr.bf16.vlgmr.msra.gmra.mxu1 %v381_v24 }
  0x84   :  { %v68_v29 = vpop.permute.xlu1 %67  ;;  %v58_v30 = vpop.permute.xlu0 %57 }
  0x88   :  { %v73_v41 = vpop.permute.xlu1 %72  ;;  %v63_v42 = vpop.permute.xlu0 %62 }
  0xe2   :  { %v331_v25 = vpop.f32.mrf.mxu0  ;;  %v337_v26 = vpop.f32.mrf.mxu1 }
  0xe4   :  { %v332_v27 = vpop.f32.mrf.mxu0  ;;  %v338_v28 = vpop.f32.mrf.mxu1 }
  0xe5   :  { %v333_v31 = vadd.f32 %v332_v27, %v331_v25  ;;  %v339_v32 = vadd.f32 %v338_v28, %v337_v26 }
  0xe6   :  { %v334_v33 = vpop.f32.mrf.mxu0  ;;  %v340_v34 = vpop.f32.mrf.mxu1 }
  0xe7   :  { %v226_v35 = vadd.f32 %v333_v31, %v58_v30  ;;  %v234_v36 = vadd.f32 %v339_v32, %v68_v29 }
  0xe8   :  { %v335_v37 = vpop.f32.mrf.mxu0  ;;  %v341_v38 = vpop.f32.mrf.mxu1 }
  0xe9   :  { %v336_v39 = vadd.f32 %v335_v37, %v334_v33  ;;  %v342_v40 = vadd.f32 %v341_v38, %v340_v34  ;;  %v244_v43 = vmul.f32 0.2, %v226_v35  ;;  %v246_v44 = vmul.f32 0.2, %v234_v36 }
  0xea   :  { %vm240_vm0 = vcmp.gt.f32.partialorder %v226_v35, 0.0  ;;  %vm242_vm1 = vcmp.gt.f32.partialorder %v234_v36, 0.0 }
  0xeb   :  { %v229_v45 = vadd.f32 %v336_v39, %v63_v42  ;;  %v237_v46 = vadd.f32 %v342_v40, %v73_v41  ;;  %v248_v49 = vsel %vm240_vm0, %v226_v35, %v244_v43  ;;  %v250_v50 = vsel %vm242_vm1, %v234_v36, %v246_v44 }
  0xed   :  { %vm241_vm2 = vcmp.gt.f32.partialorder %v229_v45, 0.0  ;;  %v245_v47 = vmul.f32 0.2, %v229_v45  ;;  %vm243_vm3 = vcmp.gt.f32.partialorder %v237_v46, 0.0  ;;  %v247_v48 = vmul.f32 0.2, %v237_v46 }
  0xef   :  { %v249_v51 = vsel %vm241_vm2, %v229_v45, %v245_v47  ;;  %v251_v52 = vsel %vm243_vm3, %v237_v46, %v247_v48 }
  0xf0   :  { %v307_v53 = vpack.c.bf16 %v249_v51, %v248_v49  ;;  %v312_v54 = vpack.c.bf16 %v251_v52, %v250_v50 }
  0xf2   :  { %308 = vst [vmem:[%s486_s3] sm:$0xff] %v307_v53   ;;  %314 = vst [vmem:[%s486_s3 + $0x8] sm:$0xff] %v312_v54  }

// kernel: _lambda_.9
= control target key start
LH: loop header
LB: loop body
LE: loop exit
PB: predicated region body
PF: predicated region fallthrough
CT: control target
= control target key end

     0   :  { %v817_v1 = vmov 0   ;;  %vm601_vm1 = vcmask 257024   ;;  %s1038_s1 = inlined_call_operand.vmem [shape: bf16[512,32], index: 1, kind: input, shape index: {}]   ;;  %s1039_s0 = inlined_call_operand.vmem [shape: bf16[64,512], index: 0, kind: input, shape index: {}]   ;;  %s1040_s2 = inlined_call_operand.vmem [shape: f32[64,1], index: 2, kind: input, shape index: {}]   ;;  %s1041_s3 = inlined_call_operand.vmem [shape: bf16[64,32], index: 3, kind: output, shape index: {}]  }
   0x1   :  { %v761_v0 = vld [vmem:[%s1038_s1 + $0x78] sm:$0xff]   ;;  %759 = vset.pattern.permute.xlu0 %v817_v1  ;;  %760 = vset.pattern.permute.xlu1 %v817_v1  ;;  %v765_v5 = vld [vmem:[%s1038_s1 + $0x70] sm:$0xff]   ;;  %v769_v9 = vld [vmem:[%s1038_s1 + $0x68] sm:$0xff]  }
   0x2   :  { %v762_v2 = vld [vmem:[%s1038_s1 + $0xf8] sm:$0xff]   ;;  %678 = vmatprep.subr.bf16.mxu0 %v761_v0  ;;  %v766_v6 = vld [vmem:[%s1038_s1 + $0xf0] sm:$0xff]   ;;  %v770_v10 = vld [vmem:[%s1038_s1 + $0xe8] sm:$0xff]  }
   0x3   :  { %v763_v3 = vld [vmem:[%s1038_s1 + $0x38] sm:$0xff]   ;;  %718 = vmatprep.subr.bf16.mxu1 %v762_v2  ;;  %v767_v7 = vld [vmem:[%s1038_s1 + $0x30] sm:$0xff]   ;;  %v771_v11 = vld [vmem:[%s1038_s1 + $0x28] sm:$0xff]  }
   0x4   :  { %v764_v4 = vld [vmem:[%s1038_s1 + $0xb8] sm:$0xff]   ;;  %679 = vmatpush3.bf16.msra.mxu0 %v763_v3  ;;  %v768_v8 = vld [vmem:[%s1038_s1 + $0xb0] sm:$0xff]   ;;  %v772_v12 = vld [vmem:[%s1038_s1 + $0xa8] sm:$0xff]  }
   0x5   :  { %719 = vmatpush3.bf16.msra.mxu1 %v764_v4  ;;  %680 = vmatprep.subr.bf16.mxu0 %v765_v5  ;;  %v773_v13 = vld [vmem:[%s1038_s1 + $0x60] sm:$0xff]   ;;  %v777_v17 = vld [vmem:[%s1038_s1 + $0x58] sm:$0xff]   ;;  %v781_v21 = vld [vmem:[%s1038_s1 + $0x50] sm:$0xff]  }
   0x6   :  { %720 = vmatprep.subr.bf16.mxu1 %v766_v6  ;;  %v774_v14 = vld [vmem:[%s1038_s1 + $0xe0] sm:$0xff]   ;;  %v778_v18 = vld [vmem:[%s1038_s1 + $0xd8] sm:$0xff]   ;;  %v782_v22 = vld [vmem:[%s1038_s1 + $0xd0] sm:$0xff]  }
   0x7   :  { %v775_v15 = vld [vmem:[%s1038_s1 + $0x20] sm:$0xff]   ;;  %v779_v19 = vld [vmem:[%s1038_s1 + $0x18] sm:$0xff]   ;;  %v783_v23 = vld [vmem:[%s1038_s1 + $0x10] sm:$0xff]  }
   0x8   :  { %681 = vmatpush3.bf16.msra.mxu0 %v767_v7  ;;  %v776_v16 = vld [vmem:[%s1038_s1 + $0xa0] sm:$0xff]   ;;  %v780_v20 = vld [vmem:[%s1038_s1 + $0x98] sm:$0xff]   ;;  %v784_v24 = vld [vmem:[%s1038_s1 + $0x90] sm:$0xff]  }
   0x9   :  { %721 = vmatpush3.bf16.msra.mxu1 %v768_v8  ;;  %682 = vmatprep.subr.bf16.mxu0 %v769_v9  ;;  %v785_v25 = vld [vmem:[%s1038_s1 + $0x48] sm:$0xff]   ;;  %v789_v29 = vld [vmem:[%s1038_s1 + $0x40] sm:$0xff]   ;;  %v97_v44 = vld [vmem:[%s1040_s2 + $0x10] sm:$0xff] }
   0xa   :  { %722 = vmatprep.subr.bf16.mxu1 %v770_v10  ;;  %v786_v26 = vld [vmem:[%s1038_s1 + $0xc8] sm:$0xff]   ;;  %v790_v30 = vld [vmem:[%s1038_s1 + $0xc0] sm:$0xff]   ;;  %115 = vperm.xlu1 %760, %v97_v44   ;;  %v98_v46 = vld [vmem:[%s1040_s2 + $0x18] sm:$0xff] }
   0xb   :  { %v787_v27 = vld [vmem:[%s1038_s1 + $0x8] sm:$0xff]   ;;  %v791_v31 = vld [vmem:[%s1038_s1] sm:$0xff]   ;;  %v101_v53 = vld [vmem:[%s1040_s2 + $0x30] sm:$0xff] }
   0xc   :  { %683 = vmatpush3.bf16.msra.mxu0 %v771_v11  ;;  %v788_v28 = vld [vmem:[%s1038_s1 + $0x88] sm:$0xff]   ;;  %v792_v32 = vld [vmem:[%s1038_s1 + $0x80] sm:$0xff]   ;;  %v102_v54 = vld [vmem:[%s1040_s2 + $0x38] sm:$0xff] }
   0xd   :  { %723 = vmatpush3.bf16.msra.mxu1 %v772_v12  ;;  %684 = vmatprep.subr.bf16.mxu0 %v773_v13  ;;  %v793_v33 = vld [vmem:[%s1039_s0] ss:$16 sps:$4 sm:$0xff]   ;;  %v795_v34 = vld [vmem:[%s1039_s0 + $0x4] ss:$16 sps:$4 sm:$0xff]   ;;  %v796_v35 = vld [vmem:[%s1039_s0 + $0x8] ss:$16 sps:$4 sm:$0xff]  }
   0xe   :  { %724 = vmatprep.subr.bf16.mxu1 %v774_v14  ;;  %v798_v36 = vld [vmem:[%s1039_s0 + $0xc] ss:$16 sps:$4 sm:$0xff]   ;;  %447 = vmatprep.mubr.bf16.mxu0 %v795_v34  ;;  %v799_v37 = vld [vmem:[%s1039_s0 + $0x24] ss:$16 sps:$4 sm:$0xff]   ;;  %v803_v39 = vld [vmem:[%s1039_s0 + $0x20] ss:$16 sps:$4 sm:$0xff]  }
   0xf   :  { %512 = vmatprep.mubr.bf16.mxu1 %v798_v36  ;;  %v801_v38 = vld [vmem:[%s1039_s0 + $0x2c] ss:$16 sps:$4 sm:$0xff]   ;;  %v804_v40 = vld [vmem:[%s1039_s0 + $0x28] ss:$16 sps:$4 sm:$0xff]   ;;  %v805_v41 = vld [vmem:[%s1039_s0 + $0x44] ss:$16 sps:$4 sm:$0xff]   ;;  %120 = vperm.xlu1 %760, %v98_v46  }
  0x10   :  { %685 = vmatpush3.bf16.msra.mxu0 %v775_v15  ;;  %v807_v42 = vld [vmem:[%s1039_s0 + $0x4c] ss:$16 sps:$4 sm:$0xff]   ;;  %v95_v43 = vld [vmem:[%s1040_s2] sm:$0xff]  ;;  %v810_v49 = vld [vmem:[%s1039_s0 + $0x48] ss:$16 sps:$4 sm:$0xff]  }
  0x11   :  { %725 = vmatpush3.bf16.msra.mxu1 %v776_v16  ;;  %686 = vmatprep.subr.bf16.mxu0 %v777_v17  ;;  %v96_v45 = vld [vmem:[%s1040_s2 + $0x8] sm:$0xff]  ;;  %v809_v47 = vld [vmem:[%s1039_s0 + $0x40] ss:$16 sps:$4 sm:$0xff]   ;;  %v811_v50 = vld [vmem:[%s1039_s0 + $0x64] ss:$16 sps:$4 sm:$0xff]  }
  0x12   :  { %726 = vmatprep.subr.bf16.mxu1 %v778_v18  ;;  %105 = vperm.xlu0 %759, %v95_v43   ;;  %v99_v48 = vld [vmem:[%s1040_s2 + $0x20] sm:$0xff]  ;;  %v100_v51 = vld [vmem:[%s1040_s2 + $0x28] sm:$0xff] }
  0x13   :  { %v813_v52 = vld [vmem:[%s1039_s0 + $0x6c] ss:$16 sps:$4 sm:$0xff]   ;;  %130 = vperm.xlu1 %760, %v100_v51   ;;  %v815_v55 = vld [vmem:[%s1039_s0 + $0x60] ss:$16 sps:$4 sm:$0xff]   ;;  %v816_v56 = vld [vmem:[%s1039_s0 + $0x68] ss:$16 sps:$4 sm:$0xff]  }
  0x14   :  { %687 = vmatpush3.bf16.msra.mxu0 %v779_v19 }
  0x15   :  { %727 = vmatpush3.bf16.msra.mxu1 %v780_v20  ;;  %688 = vmatprep.subr.bf16.mxu0 %v781_v21 }
  0x16   :  { %728 = vmatprep.subr.bf16.mxu1 %v782_v22  ;;  %110 = vperm.xlu0 %759, %v96_v45  }
  0x17   :  { %140 = vperm.xlu1 %760, %v102_v54  }
  0x18   :  { %689 = vmatpush3.bf16.msra.mxu0 %v783_v23 }
  0x19   :  { %729 = vmatpush3.bf16.msra.mxu1 %v784_v24  ;;  %690 = vmatprep.subr.bf16.mxu0 %v785_v25 }
  0x1a   :  { %730 = vmatprep.subr.bf16.mxu1 %v786_v26  ;;  %125 = vperm.xlu0 %759, %v99_v48  }
  0x1c   :  { %691 = vmatpush3.bf16.msra.mxu0 %v787_v27 }
  0x1d   :  { %731 = vmatpush3.bf16.msra.mxu1 %v788_v28  ;;  %692 = vmatprep.subr.bf16.mxu0 %v789_v29 }
  0x1e   :  { %732 = vmatprep.subr.bf16.mxu1 %v790_v30  ;;  %135 = vperm.xlu0 %759, %v101_v53  }
  0x20   :  { %693 = vmatpush3.bf16.msra.mxu0 %v791_v31 }
  0x21   :  { %733 = vmatpush3.bf16.msra.mxu1 %v792_v32 }
  0x23   :  { %448 = vmatmul.mubr.bf16.vlgmr.msra.gmra.mxu0 %v793_v33 }
  0x24   :  { %513 = vmatmul.mubr.bf16.vlgmr.msra.gmra.mxu1 %v796_v35  ;;  %455 = vmatprep.mubr.bf16.mxu0 %v799_v37 }
  0x25   :  { %520 = vmatprep.mubr.bf16.mxu1 %v801_v38 }
  0x2b   :  { %456 = vmatmul.mubr.bf16.gmra.mxu0 %v803_v39 }
  0x2c   :  { %521 = vmatmul.mubr.bf16.gmra.mxu1 %v804_v40  ;;  %463 = vmatprep.mubr.bf16.mxu0 %v805_v41 }
  0x2d   :  { %528 = vmatprep.mubr.bf16.mxu1 %v807_v42 }
  0x33   :  { %464 = vmatmul.mubr.bf16.gmra.mxu0 %v809_v47 }
  0x34   :  { %529 = vmatmul.mubr.bf16.gmra.mxu1 %v810_v49  ;;  %471 = vmatprep.mubr.bf16.mxu0 %v811_v50 }
  0x35   :  { %536 = vmatprep.mubr.bf16.mxu1 %v813_v52 }
  0x3b   :  { %472 = vmatmul.mubr.bf16.gmra.mxu0 %v815_v55 }
  0x3c   :  { %537 = vmatmul.mubr.bf16.gmra.mxu1 %v816_v56 }
  0x85   :  { %v116_v13 = vpop.permute.xlu1 %115 }
  0x8a   :  { %v121_v31 = vpop.permute.xlu1 %120 }
  0x8d   :  { %v106_v58 = vpop.permute.xlu0 %105 }
  0x8e   :  { %v131_v55 = vpop.permute.xlu1 %130 }
  0x91   :  { %v111_v4 = vpop.permute.xlu0 %110 }
  0x95   :  { %v126_v43 = vpop.permute.xlu0 %125 }
  0xe3   :  { %v694_v57 = vpop.f32.mrf.mxu0 }
  0xe4   :  { %v734_v59 = vpop.f32.mrf.mxu1 }
  0xe5   :  { %v695_v60 = vpop.f32.mrf.mxu0 }
  0xe6   :  { %v696_v61 = vadd.f32 %v695_v60, %v694_v57  ;;  %v735_v62 = vpop.f32.mrf.mxu1 }
  0xe7   :  { %v697_v63 = vpop.f32.mrf.mxu0  ;;  %v736_v0 = vadd.f32 %v735_v62, %v734_v59 }
  0xe8   :  { %v450_v1 = vadd.f32 %v696_v61, %v106_v58  ;;  %v737_v2 = vpop.f32.mrf.mxu1 }
  0xe9   :  { %v698_v3 = vpop.f32.mrf.mxu0 }
  0xea   :  { %v515_v5 = vadd.f32 %v736_v0, %v450_v1  ;;  %v699_v6 = vadd.f32 %v698_v3, %v697_v63  ;;  %v738_v7 = vpop.f32.mrf.mxu1  ;;  %v136_v3 = vpop.permute.xlu0 %135 }
  0xeb   :  { %v700_v8 = vpop.f32.mrf.mxu0  ;;  %v739_v10 = vadd.f32 %v738_v7, %v737_v2 }
  0xec   :  { %vm545_vm0 = vcmp.gt.f32.partialorder %v515_v5, 0.0  ;;  %v553_v9 = vmul.f32 0.2, %v515_v5  ;;  %v453_v11 = vadd.f32 %v699_v6, %v111_v4  ;;  %v740_v12 = vpop.f32.mrf.mxu1 }
  0xed   :  { %v701_v14 = vpop.f32.mrf.mxu0 }
  0xee   :  { %v561_v15 = vsel %vm545_vm0, %v515_v5, %v553_v9  ;;  %v518_v16 = vadd.f32 %v739_v10, %v453_v11  ;;  %v702_v17 = vadd.f32 %v701_v14, %v700_v8  ;;  %v741_v18 = vpop.f32.mrf.mxu1  ;;  %v141_v14 = vpop.permute.xlu1 %140 }
  0xef   :  { %v670_v19 = vpack.c.bf16 %v561_v15, %v561_v15  ;;  %v703_v20 = vpop.f32.mrf.mxu0  ;;  %v742_v23 = vadd.f32 %v741_v18, %v740_v12 }
  0xf0   :  { %vm546_vm2 = vcmp.gt.f32.partialorder %v518_v16, 0.0  ;;  %v554_v21 = vmul.f32 0.2, %v518_v16  ;;  %v458_v22 = vadd.f32 %v702_v17, %v116_v13  ;;  %v743_v24 = vpop.f32.mrf.mxu1 }
  0xf1   :  { %602 = vst.msk [vmem:[%s1041_s3] sm:$0xf] %vm601_vm1, %v670_v19  ;;  %v704_v25 = vpop.f32.mrf.mxu0 }
  0xf2   :  { %v562_v26 = vsel %vm546_vm2, %v518_v16, %v554_v21  ;;  %v523_v27 = vadd.f32 %v742_v23, %v458_v22  ;;  %v705_v28 = vadd.f32 %v704_v25, %v703_v20  ;;  %v744_v29 = vpop.f32.mrf.mxu1 }
  0xf3   :  { %v671_v30 = vpack.c.bf16 %v562_v26, %v562_v26  ;;  %v706_v32 = vpop.f32.mrf.mxu0  ;;  %v745_v35 = vadd.f32 %v744_v29, %v743_v24 }
  0xf4   :  { %vm547_vm3 = vcmp.gt.f32.partialorder %v523_v27, 0.0  ;;  %v555_v33 = vmul.f32 0.2, %v523_v27  ;;  %v461_v34 = vadd.f32 %v705_v28, %v121_v31  ;;  %v746_v36 = vpop.f32.mrf.mxu1 }
  0xf5   :  { %603 = vst.msk [vmem:[%s1041_s3 + $0x4] sm:$0xf] %vm601_vm1, %v671_v30  ;;  %v707_v37 = vpop.f32.mrf.mxu0 }
  0xf6   :  { %v563_v38 = vsel %vm547_vm3, %v523_v27, %v555_v33  ;;  %v526_v39 = vadd.f32 %v745_v35, %v461_v34  ;;  %v708_v40 = vadd.f32 %v707_v37, %v706_v32  ;;  %v747_v41 = vpop.f32.mrf.mxu1 }
  0xf7   :  { %v672_v42 = vpack.c.bf16 %v563_v38, %v563_v38  ;;  %v709_v44 = vpop.f32.mrf.mxu0  ;;  %v748_v47 = vadd.f32 %v747_v41, %v746_v36 }
  0xf8   :  { %vm548_vm4 = vcmp.gt.f32.partialorder %v526_v39, 0.0  ;;  %v556_v45 = vmul.f32 0.2, %v526_v39  ;;  %v466_v46 = vadd.f32 %v708_v40, %v126_v43  ;;  %v749_v48 = vpop.f32.mrf.mxu1 }
  0xf9   :  { %604 = vst.msk [vmem:[%s1041_s3 + $0x8] sm:$0xf] %vm601_vm1, %v672_v42  ;;  %v710_v49 = vpop.f32.mrf.mxu0 }
  0xfa   :  { %v564_v50 = vsel %vm548_vm4, %v526_v39, %v556_v45  ;;  %v531_v51 = vadd.f32 %v748_v47, %v466_v46  ;;  %v711_v52 = vadd.f32 %v710_v49, %v709_v44  ;;  %v750_v53 = vpop.f32.mrf.mxu1 }
  0xfb   :  { %v673_v54 = vpack.c.bf16 %v564_v50, %v564_v50  ;;  %v712_v56 = vpop.f32.mrf.mxu0  ;;  %v751_v59 = vadd.f32 %v750_v53, %v749_v48 }
  0xfc   :  { %vm549_vm5 = vcmp.gt.f32.partialorder %v531_v51, 0.0  ;;  %v557_v57 = vmul.f32 0.2, %v531_v51  ;;  %v469_v58 = vadd.f32 %v711_v52, %v131_v55  ;;  %v752_v60 = vpop.f32.mrf.mxu1 }
  0xfd   :  { %605 = vst.msk [vmem:[%s1041_s3 + $0xc] sm:$0xf] %vm601_vm1, %v673_v54  ;;  %v713_v61 = vpop.f32.mrf.mxu0 }
  0xfe   :  { %v565_v62 = vsel %vm549_vm5, %v531_v51, %v557_v57  ;;  %v534_v63 = vadd.f32 %v751_v59, %v469_v58  ;;  %v714_v0 = vadd.f32 %v713_v61, %v712_v56  ;;  %v753_v1 = vpop.f32.mrf.mxu1 }
  0xff   :  { %v674_v2 = vpack.c.bf16 %v565_v62, %v565_v62  ;;  %v715_v4 = vpop.f32.mrf.mxu0  ;;  %v754_v7 = vadd.f32 %v753_v1, %v752_v60 }
 0x100   :  { %vm550_vm6 = vcmp.gt.f32.partialorder %v534_v63, 0.0  ;;  %v558_v5 = vmul.f32 0.2, %v534_v63  ;;  %v474_v6 = vadd.f32 %v714_v0, %v136_v3  ;;  %v755_v8 = vpop.f32.mrf.mxu1 }
 0x101   :  { %606 = vst.msk [vmem:[%s1041_s3 + $0x10] sm:$0xf] %vm601_vm1, %v674_v2  ;;  %v716_v9 = vpop.f32.mrf.mxu0 }
 0x102   :  { %v566_v10 = vsel %vm550_vm6, %v534_v63, %v558_v5  ;;  %v539_v11 = vadd.f32 %v754_v7, %v474_v6  ;;  %v717_v12 = vadd.f32 %v716_v9, %v715_v4  ;;  %v756_v13 = vpop.f32.mrf.mxu1 }
 0x103   :  { %v675_v15 = vpack.c.bf16 %v566_v10, %v566_v10  ;;  %v757_v18 = vadd.f32 %v756_v13, %v755_v8 }
 0x104   :  { %vm551_vm7 = vcmp.gt.f32.partialorder %v539_v11, 0.0  ;;  %v559_v16 = vmul.f32 0.2, %v539_v11  ;;  %v477_v17 = vadd.f32 %v717_v12, %v141_v14 }
 0x105   :  { %607 = vst.msk [vmem:[%s1041_s3 + $0x14] sm:$0xf] %vm601_vm1, %v675_v15 }
 0x106   :  { %v567_v19 = vsel %vm551_vm7, %v539_v11, %v559_v16  ;;  %v542_v20 = vadd.f32 %v757_v18, %v477_v17 }
 0x107   :  { %v676_v21 = vpack.c.bf16 %v567_v19, %v567_v19 }
 0x108   :  { %vm552_vm8 = vcmp.gt.f32.partialorder %v542_v20, 0.0  ;;  %v560_v22 = vmul.f32 0.2, %v542_v20 }
 0x109   :  { %608 = vst.msk [vmem:[%s1041_s3 + $0x18] sm:$0xf] %vm601_vm1, %v676_v21 }
 0x10a   :  { %v568_v23 = vsel %vm552_vm8, %v542_v20, %v560_v22 }
 0x10b   :  { %v677_v24 = vpack.c.bf16 %v568_v23, %v568_v23 }
 0x10d   :  { %609 = vst.msk [vmem:[%s1041_s3 + $0x1c] sm:$0xf] %vm601_vm1, %v677_v24 }

// kernel: _lambda_.10
= control target key start
LH: loop header
LB: loop body
LE: loop exit
PB: predicated region body
PF: predicated region fallthrough
CT: control target
= control target key end

     0   :  { %v1093_v1 = vmov 0   ;;  %vm563_vm0 = vcmask 654336   ;;  %vm827_vm2 = vcmask 257024   ;;  %s1414_s1 = inlined_call_operand.vmem [shape: bf16[720,32], index: 1, kind: input, shape index: {}]   ;;  %s1415_s0 = inlined_call_operand.vmem [shape: bf16[64,720], index: 0, kind: input, shape index: {}]   ;;  %s1416_s2 = inlined_call_operand.vmem [shape: f32[64,1], index: 2, kind: input, shape index: {}]   ;;  %s1417_s3 = inlined_call_operand.vmem [shape: bf16[64,32], index: 3, kind: output, shape index: {}]  }
   0x1   :  { %v1012_v0 = vld [vmem:[%s1414_s1 + $0x78] sm:$0xff]   ;;  %706 = vmatprep.subr.bf16.mxu0 %v1093_v1  ;;  %1010 = vset.pattern.permute.xlu0 %v1093_v1  ;;  %v1014_v3 = vld [vmem:[%s1414_s1 + $0x70] sm:$0xff]   ;;  %v1016_v5 = vld [vmem:[%s1414_s1 + $0x68] sm:$0xff]  }
   0x2   :  { %v1013_v2 = vld [vmem:[%s1414_s1 + $0x38] sm:$0xff]   ;;  %1011 = vset.pattern.permute.xlu1 %v1093_v1  ;;  %929 = vmatprep.subr.bf16.mxu1 %v1012_v0  ;;  %v1015_v4 = vld [vmem:[%s1414_s1 + $0x30] sm:$0xff]   ;;  %v1017_v6 = vld [vmem:[%s1414_s1 + $0x28] sm:$0xff]  }
   0x3   :  { %930 = vmatpush3.bf16.msra.mxu1 %v1013_v2  ;;  %v1018_v7 = vld [vmem:[%s1414_s1 + $0x60] sm:$0xff]   ;;  %v1020_v8 = vld [vmem:[%s1414_s1 + $0x138] sm:$0xff]   ;;  %v1023_v10 = vld [vmem:[%s1414_s1 + $0x130] sm:$0xff]  }
   0x4   :  { %931 = vmatprep.subr.bf16.mxu1 %v1014_v3  ;;  %v1019_v9 = vld [vmem:[%s1414_s1 + $0x20] sm:$0xff]   ;;  %707 = vmatpush1.bf16.msra.mxu0 %v1020_v8  ;;  %v1021_v11 = vld [vmem:[%s1414_s1 + $0x58] sm:$0xff]   ;;  %v1026_v12 = vld [vmem:[%s1414_s1 + $0x128] sm:$0xff]  }
   0x5   :  { %708 = vmatprep.subr.bf16.mxu0 %v1093_v1  ;;  %v1022_v13 = vld [vmem:[%s1414_s1 + $0x18] sm:$0xff]   ;;  %v1024_v14 = vld [vmem:[%s1414_s1 + $0x50] sm:$0xff]   ;;  %v1029_v15 = vld [vmem:[%s1414_s1 + $0x120] sm:$0xff]  }
   0x6   :  { %v1025_v16 = vld [vmem:[%s1414_s1 + $0x10] sm:$0xff]   ;;  %v1027_v17 = vld [vmem:[%s1414_s1 + $0x48] sm:$0xff]   ;;  %v1032_v18 = vld [vmem:[%s1414_s1 + $0x118] sm:$0xff]  }
   0x7   :  { %932 = vmatpush3.bf16.msra.mxu1 %v1015_v4  ;;  %v1035_v19 = vld [vmem:[%s1415_s0 + $0x4] ss:$24 sps:$4 sm:$0xff]   ;;  %v1028_v20 = vld [vmem:[%s1414_s1 + $0x8] sm:$0xff]   ;;  %v1038_v22 = vld [vmem:[%s1414_s1 + $0x110] sm:$0xff]  }
   0x8   :  { %933 = vmatprep.subr.bf16.mxu1 %v1016_v5  ;;  %709 = vmatpush1.bf16.msra.mxu0 %v1023_v10  ;;  %v1030_v21 = vld [vmem:[%s1414_s1 + $0x40] sm:$0xff]   ;;  %v1036_v24 = vld [vmem:[%s1414_s1 + $0xf8] sm:$0xff]   ;;  %v1041_v27 = vld [vmem:[%s1414_s1 + $0x108] sm:$0xff]  }
   0x9   :  { %710 = vmatprep.subr.bf16.mxu0 %v1093_v1  ;;  %608 = vmatprep.mubr.bf16.mxu1 %v1035_v19  ;;  %v1031_v23 = vld [vmem:[%s1414_s1] sm:$0xff]   ;;  %v1037_v26 = vld [vmem:[%s1414_s1 + $0xb8] sm:$0xff]   ;;  %v1042_v28 = vld [vmem:[%s1415_s0 + $0x34] ss:$24 sps:$4 sm:$0xff]  }
   0xa   :  { %v1033_v25 = vld [vmem:[%s1415_s0] ss:$24 sps:$4 sm:$0xff]   ;;  %v1039_v29 = vld [vmem:[%s1414_s1 + $0xf0] sm:$0xff]   ;;  %v1045_v33 = vld [vmem:[%s1414_s1 + $0xe8] sm:$0xff]  }
   0xb   :  { %934 = vmatpush3.bf16.msra.mxu1 %v1017_v6  ;;  %v1047_v30 = vld [vmem:[%s1414_s1 + $0x100] sm:$0xff]   ;;  %v1040_v31 = vld [vmem:[%s1414_s1 + $0xb0] sm:$0xff]   ;;  %v1046_v34 = vld [vmem:[%s1414_s1 + $0xa8] sm:$0xff]  }
   0xc   :  { %935 = vmatprep.subr.bf16.mxu1 %v1018_v7  ;;  %711 = vmatpush1.bf16.msra.mxu0 %v1026_v12  ;;  %v1044_v32 = vld [vmem:[%s1415_s0 + $0x30] ss:$24 sps:$4 sm:$0xff]   ;;  %v1050_v35 = vld [vmem:[%s1414_s1 + $0x160] sm:$0xff]   ;;  %v1056_v38 = vld [vmem:[%s1414_s1 + $0x158] sm:$0xff]  }
   0xd   :  { %712 = vmatprep.subr.bf16.mxu0 %v1093_v1  ;;  %v1051_v36 = vld [vmem:[%s1415_s0 + $0x64] ss:$24 sps:$4 sm:$0xff]   ;;  %v1053_v40 = vld [vmem:[%s1415_s0 + $0x60] ss:$24 sps:$4 sm:$0xff]   ;;  %v1059_v43 = vld [vmem:[%s1414_s1 + $0x150] sm:$0xff]  }
   0xe   :  { %v1048_v37 = vld [vmem:[%s1414_s1 + $0xe0] sm:$0xff]   ;;  %v1054_v41 = vld [vmem:[%s1414_s1 + $0xd8] sm:$0xff]   ;;  %v1060_v44 = vld [vmem:[%s1415_s0 + $0x94] ss:$24 sps:$4 sm:$0xff]  }
   0xf   :  { %936 = vmatpush3.bf16.msra.mxu1 %v1019_v9  ;;  %v1049_v39 = vld [vmem:[%s1414_s1 + $0xa0] sm:$0xff]   ;;  %v1055_v42 = vld [vmem:[%s1414_s1 + $0x98] sm:$0xff]   ;;  %v1057_v45 = vld [vmem:[%s1414_s1 + $0xd0] sm:$0xff]  }
  0x10   :  { %937 = vmatprep.subr.bf16.mxu1 %v1021_v11  ;;  %713 = vmatpush1.bf16.msra.mxu0 %v1029_v15  ;;  %v1065_v46 = vld [vmem:[%s1414_s1 + $0x148] sm:$0xff]   ;;  %v1058_v47 = vld [vmem:[%s1414_s1 + $0x90] sm:$0xff]   ;;  %v1068_v51 = vld [vmem:[%s1414_s1 + $0x140] sm:$0xff]  }
  0x11   :  { %714 = vmatprep.subr.bf16.mxu0 %v1093_v1  ;;  %v1063_v48 = vld [vmem:[%s1414_s1 + $0xc8] sm:$0xff]   ;;  %v1066_v54 = vld [vmem:[%s1414_s1 + $0xc0] sm:$0xff]   ;;  %v131_v59 = vld [vmem:[%s1416_s2 + $0x10] sm:$0xff] }
  0x12   :  { %v1074_v49 = vld [vmem:[%s1415_s0 + $0x14] ss:$24 sps:$4 sm:$0xff]   ;;  %v1062_v50 = vld [vmem:[%s1415_s0 + $0x90] ss:$24 sps:$4 sm:$0xff]   ;;  %v1078_v56 = vld [vmem:[%s1415_s0 + $0x44] ss:$24 sps:$4 sm:$0xff]   ;;  %149 = vperm.xlu1 %1011, %v131_v59  }
  0x13   :  { %938 = vmatpush3.bf16.msra.mxu1 %v1022_v13  ;;  %909 = vmatprep.mubr.msk.bf16.mxu0 %vm563_vm0, %v1074_v49  ;;  %v1064_v52 = vld [vmem:[%s1414_s1 + $0x88] sm:$0xff]   ;;  %v1067_v57 = vld [vmem:[%s1414_s1 + $0x80] sm:$0xff]   ;;  %v1075_v61 = vld [vmem:[%s1415_s0 + $0x3c] ss:$24 sps:$4 sm:$0xff]  }
  0x14   :  { %939 = vmatprep.subr.bf16.mxu1 %v1024_v14  ;;  %715 = vmatpush1.bf16.msra.mxu0 %v1032_v18  ;;  %v1071_v53 = vld [vmem:[%s1415_s0 + $0xc] ss:$24 sps:$4 sm:$0xff]   ;;  %v1072_v55 = vld [vmem:[%s1415_s0 + $0x10] ss:$24 sps:$4 sm:$0xff]   ;;  %v132_v63 = vld [vmem:[%s1416_s2 + $0x18] sm:$0xff] }
  0x15   :  { %716 = vmatprep.subr.bf16.mxu0 %v1093_v1  ;;  %v129_v58 = vld [vmem:[%s1416_s2] sm:$0xff]  ;;  %v130_v62 = vld [vmem:[%s1416_s2 + $0x8] sm:$0xff]  ;;  %v1077_v4 = vld [vmem:[%s1415_s0 + $0x38] ss:$24 sps:$4 sm:$0xff]  }
  0x16   :  { %v1069_v60 = vld [vmem:[%s1415_s0 + $0x8] ss:$24 sps:$4 sm:$0xff]   ;;  %139 = vperm.xlu0 %1010, %v129_v58   ;;  %154 = vperm.xlu1 %1011, %v132_v63   ;;  %v1081_v5 = vld [vmem:[%s1415_s0 + $0x6c] ss:$24 sps:$4 sm:$0xff]   ;;  %v135_v6 = vld [vmem:[%s1416_s2 + $0x30] sm:$0xff] }
  0x17   :  { %940 = vmatpush3.bf16.msra.mxu1 %v1025_v16  ;;  %v1080_v0 = vld [vmem:[%s1415_s0 + $0x40] ss:$24 sps:$4 sm:$0xff]   ;;  %v134_v3 = vld [vmem:[%s1416_s2 + $0x28] sm:$0xff]  ;;  %v1090_v9 = vld [vmem:[%s1415_s0 + $0xa4] ss:$24 sps:$4 sm:$0xff]  }
  0x18   :  { %941 = vmatprep.subr.bf16.mxu1 %v1027_v17  ;;  %717 = vmatpush1.bf16.msra.mxu0 %v1038_v22  ;;  %v133_v2 = vld [vmem:[%s1416_s2 + $0x20] sm:$0xff]  ;;  %v136_v7 = vld [vmem:[%s1416_s2 + $0x38] sm:$0xff]  ;;  %v1086_v8 = vld [vmem:[%s1415_s0 + $0x70] ss:$24 sps:$4 sm:$0xff]  }
  0x19   :  { %718 = vmatprep.subr.bf16.mxu0 %v1093_v1  ;;  %v1083_v10 = vld [vmem:[%s1415_s0 + $0x68] ss:$24 sps:$4 sm:$0xff]   ;;  %v1087_v11 = vld [vmem:[%s1415_s0 + $0x9c] ss:$24 sps:$4 sm:$0xff]   ;;  %v1089_v13 = vld [vmem:[%s1415_s0 + $0x98] ss:$24 sps:$4 sm:$0xff]  }
  0x1a   :  { %144 = vperm.xlu0 %1010, %v130_v62   ;;  %164 = vperm.xlu1 %1011, %v134_v3   ;;  %v1092_v12 = vld [vmem:[%s1415_s0 + $0xa0] ss:$24 sps:$4 sm:$0xff]  }
  0x1b   :  { %942 = vmatpush3.bf16.msra.mxu1 %v1028_v20 }
  0x1c   :  { %943 = vmatprep.subr.bf16.mxu1 %v1030_v21  ;;  %719 = vmatpush1.bf16.msra.mxu0 %v1041_v27 }
  0x1d   :  { %720 = vmatprep.subr.bf16.mxu0 %v1093_v1 }
  0x1e   :  { %159 = vperm.xlu0 %1010, %v133_v2   ;;  %174 = vperm.xlu1 %1011, %v136_v7  }
  0x1f   :  { %944 = vmatpush3.bf16.msra.mxu1 %v1031_v23 }
  0x20   :  { %969 = vmatprep.subr.bf16.mxu1 %v1036_v24  ;;  %721 = vmatpush1.bf16.msra.mxu0 %v1047_v30 }
  0x21   :  { %728 = vmatprep.subr.bf16.mxu0 %v1093_v1 }
  0x22   :  { %609 = vmatmul.mubr.bf16.vlgmr.msra.gmra.mxu1 %v1033_v25  ;;  %169 = vperm.xlu0 %1010, %v135_v6  }
  0x23   :  { %970 = vmatpush3.bf16.msra.mxu1 %v1037_v26  ;;  %616 = vmatprep.mubr.bf16.mxu1 %v1042_v28 }
  0x24   :  { %971 = vmatprep.subr.bf16.mxu1 %v1039_v29  ;;  %729 = vmatpush2.bf16.msra.mxu0 %v1050_v35 }
  0x25   :  { %730 = vmatprep.subr.bf16.mxu0 %v1093_v1 }
  0x27   :  { %972 = vmatpush3.bf16.msra.mxu1 %v1040_v31 }
  0x28   :  { %973 = vmatprep.subr.bf16.mxu1 %v1045_v33  ;;  %731 = vmatpush2.bf16.msra.mxu0 %v1056_v38 }
  0x29   :  { %732 = vmatprep.subr.bf16.mxu0 %v1093_v1 }
  0x2a   :  { %617 = vmatmul.mubr.bf16.gmra.mxu1 %v1044_v32 }
  0x2b   :  { %974 = vmatpush3.bf16.msra.mxu1 %v1046_v34  ;;  %624 = vmatprep.mubr.bf16.mxu1 %v1051_v36 }
  0x2c   :  { %975 = vmatprep.subr.bf16.mxu1 %v1048_v37  ;;  %733 = vmatpush2.bf16.msra.mxu0 %v1059_v43 }
  0x2d   :  { %734 = vmatprep.subr.bf16.mxu0 %v1093_v1 }
  0x2f   :  { %976 = vmatpush3.bf16.msra.mxu1 %v1049_v39 }
  0x30   :  { %977 = vmatprep.subr.bf16.mxu1 %v1054_v41  ;;  %735 = vmatpush2.bf16.msra.mxu0 %v1065_v46 }
  0x31   :  { %736 = vmatprep.subr.bf16.mxu0 %v1093_v1  ;;  %v1084_v1 = vld [vmem:[%s1415_s0 + $0x74] ss:$24 sps:$4 sm:$0xff]  }
  0x32   :  { %625 = vmatmul.mubr.bf16.gmra.mxu1 %v1053_v40 }
  0x33   :  { %978 = vmatpush3.bf16.msra.mxu1 %v1055_v42  ;;  %632 = vmatprep.mubr.bf16.mxu1 %v1060_v44 }
  0x34   :  { %979 = vmatprep.subr.bf16.mxu1 %v1057_v45  ;;  %737 = vmatpush2.bf16.msra.mxu0 %v1068_v51 }
  0x37   :  { %980 = vmatpush3.bf16.msra.mxu1 %v1058_v47  ;;  %739 = vmatmul.mubr.bf16.vlgmr.msra.gmra.mxu0 %v1072_v55 }
  0x38   :  { %981 = vmatprep.subr.bf16.mxu1 %v1063_v48  ;;  %910 = vmatprep.mubr.msk.bf16.mxu0 %vm563_vm0, %v1078_v56 }
  0x3a   :  { %633 = vmatmul.mubr.bf16.gmra.mxu1 %v1062_v50 }
  0x3b   :  { %982 = vmatpush3.bf16.msra.mxu1 %v1064_v52  ;;  %673 = vmatprep.mubr.bf16.mxu1 %v1071_v53 }
  0x3c   :  { %983 = vmatprep.subr.bf16.mxu1 %v1066_v54 }
  0x3f   :  { %984 = vmatpush3.bf16.msra.mxu1 %v1067_v57  ;;  %747 = vmatmul.mubr.bf16.gmra.mxu0 %v1080_v0 }
  0x40   :  { %911 = vmatprep.mubr.msk.bf16.mxu0 %vm563_vm0, %v1084_v1 }
  0x42   :  { %674 = vmatmul.mubr.bf16.vlgmr.msra.gmra.mxu1 %v1069_v60 }
  0x43   :  { %681 = vmatprep.mubr.bf16.mxu1 %v1075_v61 }
  0x47   :  { %755 = vmatmul.mubr.bf16.gmra.mxu0 %v1086_v8 }
  0x48   :  { %912 = vmatprep.mubr.msk.bf16.mxu0 %vm563_vm0, %v1090_v9 }
  0x4a   :  { %682 = vmatmul.mubr.bf16.gmra.mxu1 %v1077_v4 }
  0x4b   :  { %689 = vmatprep.mubr.bf16.mxu1 %v1081_v5 }
  0x4f   :  { %763 = vmatmul.mubr.bf16.gmra.mxu0 %v1092_v12 }
  0x52   :  { %690 = vmatmul.mubr.bf16.gmra.mxu1 %v1083_v10 }
  0x53   :  { %697 = vmatprep.mubr.bf16.mxu1 %v1087_v11 }
  0x5a   :  { %698 = vmatmul.mubr.bf16.gmra.mxu1 %v1089_v13 }
  0x8d   :  { %v150_v47 = vpop.permute.xlu1 %149 }
  0x91   :  { %v140_v31 = vpop.permute.xlu0 %139  ;;  %v155_v0 = vpop.permute.xlu1 %154 }
  0x95   :  { %v145_v42 = vpop.permute.xlu0 %144 }
  0x99   :  { %v160_v9 = vpop.permute.xlu0 %159 }
  0xe2   :  { %v945_v14 = vpop.f32.mrf.mxu1 }
  0xe4   :  { %v946_v15 = vpop.f32.mrf.mxu1 }
  0xe5   :  { %v947_v33 = vadd.f32 %v946_v15, %v945_v14 }
  0xe6   :  { %v948_v16 = vpop.f32.mrf.mxu1 }
  0xe7   :  { %v611_v38 = vadd.f32 %v947_v33, %v140_v31  ;;  %v165_v31 = vpop.permute.xlu1 %164 }
  0xe8   :  { %v949_v17 = vpop.f32.mrf.mxu1 }
  0xe9   :  { %v950_v39 = vadd.f32 %v949_v17, %v948_v16 }
  0xea   :  { %v951_v18 = vpop.f32.mrf.mxu1 }
  0xeb   :  { %v614_v49 = vadd.f32 %v950_v39, %v145_v42  ;;  %v170_v39 = vpop.permute.xlu0 %169 }
  0xec   :  { %v952_v19 = vpop.f32.mrf.mxu1 }
  0xed   :  { %v953_v46 = vadd.f32 %v952_v19, %v951_v18 }
  0xee   :  { %v954_v20 = vpop.f32.mrf.mxu1 }
  0xef   :  { %v619_v57 = vadd.f32 %v953_v46, %v150_v47 }
  0xf0   :  { %v955_v21 = vpop.f32.mrf.mxu1 }
  0xf1   :  { %v956_v59 = vadd.f32 %v955_v21, %v954_v20 }
  0xf2   :  { %v957_v22 = vpop.f32.mrf.mxu1 }
  0xf3   :  { %v622_v8 = vadd.f32 %v956_v59, %v155_v0 }
  0xf4   :  { %v958_v23 = vpop.f32.mrf.mxu1 }
  0xf5   :  { %v959_v6 = vadd.f32 %v958_v23, %v957_v22 }
  0xf6   :  { %v1364_v24 = vpop.f32.mrf.mxu1 }
  0xf7   :  { %v740_v28 = vpop.f32.mrf.mxu0  ;;  %v627_v19 = vadd.f32 %v959_v6, %v160_v9 }
  0xf8   :  { %v1366_v25 = vpop.f32.mrf.mxu1 }
  0xf9   :  { %v742_v30 = vpop.f32.mrf.mxu0  ;;  %v962_v21 = vadd.f32 %v1366_v25, %v1364_v24 }
  0xfa   :  { %v1368_v26 = vpop.f32.mrf.mxu1 }
  0xfb   :  { %v743_v34 = vpop.f32.mrf.mxu0  ;;  %v630_v25 = vadd.f32 %v962_v21, %v165_v31 }
  0xfc   :  { %v1370_v27 = vpop.f32.mrf.mxu1 }
  0xfd   :  { %v745_v36 = vpop.f32.mrf.mxu0 }
  0xfe   :  { %v1372_v29 = vpop.f32.mrf.mxu1 }
  0xff   :  { %v748_v41 = vpop.f32.mrf.mxu0 }
 0x100   :  { %v1374_v32 = vpop.f32.mrf.mxu1 }
 0x101   :  { %v750_v45 = vpop.f32.mrf.mxu0 }
 0x102   :  { %v985_v35 = vpop.f32.mrf.mxu1 }
 0x103   :  { %v751_v52 = vpop.f32.mrf.mxu0 }
 0x104   :  { %v986_v37 = vpop.f32.mrf.mxu1 }
 0x105   :  { %v987_v40 = vadd.f32 %v986_v37, %v985_v35  ;;  %v753_v56 = vpop.f32.mrf.mxu0 }
 0x106   :  { %v988_v43 = vpop.f32.mrf.mxu1 }
 0x107   :  { %v676_v44 = vadd.f32 %v987_v40, %v611_v38  ;;  %v756_v63 = vpop.f32.mrf.mxu0  ;;  %v965_v38 = vadd.f32 %v1370_v27, %v1368_v26  ;;  %v968_v27 = vadd.f32 %v1374_v32, %v1372_v29 }
 0x108   :  { %v989_v48 = vpop.f32.mrf.mxu1 }
 0x109   :  { %v741_v50 = vadd.f32 %v740_v28, %v676_v44  ;;  %v990_v51 = vadd.f32 %v989_v48, %v988_v43  ;;  %v758_v5 = vpop.f32.mrf.mxu0 }
 0x10a   :  { %v991_v53 = vpop.f32.mrf.mxu1 }
 0x10b   :  { %vm771_vm1 = vcmp.gt.f32.partialorder %v741_v50, 0.0  ;;  %v779_v54 = vmul.f32 0.2, %v741_v50  ;;  %v679_v55 = vadd.f32 %v990_v51, %v614_v49  ;;  %v759_v13 = vpop.f32.mrf.mxu0  ;;  %v635_v49 = vadd.f32 %v965_v38, %v170_v39 }
 0x10c   :  { %v992_v58 = vpop.f32.mrf.mxu1 }
 0x10d   :  { %v787_v60 = vsel %vm771_vm1, %v741_v50, %v779_v54  ;;  %v744_v61 = vadd.f32 %v743_v34, %v679_v55  ;;  %v993_v62 = vadd.f32 %v992_v58, %v991_v53  ;;  %v761_v18 = vpop.f32.mrf.mxu0  ;;  %v175_v53 = vpop.permute.xlu1 %174 }
 0x10e   :  { %v921_v1 = vpack.c.bf16 %v787_v60, %v787_v60  ;;  %v994_v2 = vpop.f32.mrf.mxu1  ;;  %v638_v59 = vadd.f32 %v968_v27, %v175_v53 }
 0x10f   :  { %vm772_vm3 = vcmp.gt.f32.partialorder %v744_v61, 0.0  ;;  %v780_v3 = vmul.f32 0.2, %v744_v61  ;;  %v684_v4 = vadd.f32 %v993_v62, %v619_v57  ;;  %v764_v30 = vpop.f32.mrf.mxu0 }
 0x110   :  { %828 = vst.msk [vmem:[%s1417_s3] sm:$0xf] %vm827_vm2, %v921_v1  ;;  %v995_v7 = vpop.f32.mrf.mxu1 }
 0x111   :  { %v788_v10 = vsel %vm772_vm3, %v744_v61, %v780_v3  ;;  %v749_v11 = vadd.f32 %v748_v41, %v684_v4  ;;  %v996_v12 = vadd.f32 %v995_v7, %v994_v2  ;;  %v766_v37 = vpop.f32.mrf.mxu0 }
 0x112   :  { %v922_v14 = vpack.c.bf16 %v788_v10, %v788_v10  ;;  %v997_v15 = vpop.f32.mrf.mxu1 }
 0x113   :  { %vm773_vm4 = vcmp.gt.f32.partialorder %v749_v11, 0.0  ;;  %v781_v16 = vmul.f32 0.2, %v749_v11  ;;  %v687_v17 = vadd.f32 %v996_v12, %v622_v8  ;;  %v767_v43 = vpop.f32.mrf.mxu0 }
 0x114   :  { %829 = vst.msk [vmem:[%s1417_s3 + $0x4] sm:$0xf] %vm827_vm2, %v922_v14  ;;  %v998_v20 = vpop.f32.mrf.mxu1 }
 0x115   :  { %v789_v22 = vsel %vm773_vm4, %v749_v11, %v781_v16  ;;  %v752_v23 = vadd.f32 %v751_v52, %v687_v17  ;;  %v999_v28 = vadd.f32 %v998_v20, %v997_v15  ;;  %v769_v48 = vpop.f32.mrf.mxu0 }
 0x116   :  { %v923_v33 = vpack.c.bf16 %v789_v22, %v789_v22  ;;  %v1000_v34 = vpop.f32.mrf.mxu1 }
 0x117   :  { %vm774_vm5 = vcmp.gt.f32.partialorder %v752_v23, 0.0  ;;  %v782_v35 = vmul.f32 0.2, %v752_v23  ;;  %v692_v36 = vadd.f32 %v999_v28, %v627_v19 }
 0x118   :  { %830 = vst.msk [vmem:[%s1417_s3 + $0x8] sm:$0xf] %vm827_vm2, %v923_v33  ;;  %v1001_v24 = vpop.f32.mrf.mxu1 }
 0x119   :  { %v790_v40 = vsel %vm774_vm5, %v752_v23, %v782_v35  ;;  %v757_v41 = vadd.f32 %v756_v63, %v692_v36  ;;  %v1002_v42 = vadd.f32 %v1001_v24, %v1000_v34 }
 0x11a   :  { %v924_v44 = vpack.c.bf16 %v790_v40, %v790_v40  ;;  %v1003_v45 = vpop.f32.mrf.mxu1 }
 0x11b   :  { %vm775_vm6 = vcmp.gt.f32.partialorder %v757_v41, 0.0  ;;  %v783_v46 = vmul.f32 0.2, %v757_v41  ;;  %v695_v47 = vadd.f32 %v1002_v42, %v630_v25 }
 0x11c   :  { %831 = vst.msk [vmem:[%s1417_s3 + $0xc] sm:$0xf] %vm827_vm2, %v924_v44  ;;  %v1004_v26 = vpop.f32.mrf.mxu1 }
 0x11d   :  { %v791_v50 = vsel %vm775_vm6, %v757_v41, %v783_v46  ;;  %v760_v51 = vadd.f32 %v759_v13, %v695_v47  ;;  %v1005_v52 = vadd.f32 %v1004_v26, %v1003_v45 }
 0x11e   :  { %v925_v54 = vpack.c.bf16 %v791_v50, %v791_v50  ;;  %v1006_v55 = vpop.f32.mrf.mxu1 }
 0x11f   :  { %vm776_vm7 = vcmp.gt.f32.partialorder %v760_v51, 0.0  ;;  %v784_v56 = vmul.f32 0.2, %v760_v51  ;;  %v700_v57 = vadd.f32 %v1005_v52, %v635_v49 }
 0x120   :  { %832 = vst.msk [vmem:[%s1417_s3 + $0x10] sm:$0xf] %vm827_vm2, %v925_v54  ;;  %v1007_v58 = vpop.f32.mrf.mxu1 }
 0x121   :  { %v792_v60 = vsel %vm776_vm7, %v760_v51, %v784_v56  ;;  %v765_v61 = vadd.f32 %v764_v30, %v700_v57  ;;  %v1008_v62 = vadd.f32 %v1007_v58, %v1006_v55 }
 0x122   :  { %v926_v29 = vpack.c.bf16 %v792_v60, %v792_v60 }
 0x123   :  { %vm777_vm8 = vcmp.gt.f32.partialorder %v765_v61, 0.0  ;;  %v785_v32 = vmul.f32 0.2, %v765_v61  ;;  %v703_v63 = vadd.f32 %v1008_v62, %v638_v59 }
 0x124   :  { %833 = vst.msk [vmem:[%s1417_s3 + $0x14] sm:$0xf] %vm827_vm2, %v926_v29 }
 0x125   :  { %v793_v0 = vsel %vm777_vm8, %v765_v61, %v785_v32  ;;  %v768_v1 = vadd.f32 %v767_v43, %v703_v63 }
 0x126   :  { %v927_v2 = vpack.c.bf16 %v793_v0, %v793_v0 }
 0x127   :  { %vm778_vm9 = vcmp.gt.f32.partialorder %v768_v1, 0.0  ;;  %v786_v3 = vmul.f32 0.2, %v768_v1 }
 0x128   :  { %834 = vst.msk [vmem:[%s1417_s3 + $0x18] sm:$0xf] %vm827_vm2, %v927_v2 }
 0x129   :  { %v794_v4 = vsel %vm778_vm9, %v768_v1, %v786_v3 }
 0x12a   :  { %v928_v5 = vpack.c.bf16 %v794_v4, %v794_v4 }
 0x12c   :  { %835 = vst.msk [vmem:[%s1417_s3 + $0x1c] sm:$0xf] %vm827_vm2, %v928_v5 }

// kernel: _lambda_.11
= control target key start
LH: loop header
LB: loop body
LE: loop exit
PB: predicated region body
PF: predicated region fallthrough
CT: control target
= control target key end

     0   :  { %v2003_v22 = vmov 1966171168   ;;  %v167_v24 = vlaneseq  ;;  %vm1508_vm0 = vcmask 1024   ;;  %vm1522_vm1 = vcmask 50184   ;;  %s2005_s28 = smov 1   ;;  %s2470_s2 = inlined_call_operand.vmem [shape: bf16[1024,1], index: 2, kind: input, shape index: {}]   ;;  %s2471_s0 = inlined_call_operand.vmem [shape: bf16[2,1024], index: 0, kind: input, shape index: {}]   ;;  %s2472_s3 = inlined_call_operand.vmem [shape: bf16[1024,7], index: 3, kind: input, shape index: {}]   ;;  %s2473_s1 = inlined_call_operand.vmem [shape: bf16[2,1024], index: 1, kind: input, shape index: {}]   ;;  %s2474_s4 = inlined_call_operand.<no memory space> [shape: f32[1,1], index: 4, kind: input, shape index: {}]   ;;  %s2475_s6 = inlined_call_operand.vmem [shape: f32[2,8], index: 6, kind: output, shape index: {}]   ;;  %s2476_s5 = inlined_call_operand.vmem [shape: f32[1,7], index: 5, kind: input, shape index: {}]  }
   0x1   :  { %v1861_v0 = vld [vmem:[%s2470_s2 + $0x78] sm:$0xff]   ;;  %v1865_v4 = vld [vmem:[%s2470_s2 + $0x70] sm:$0xff]   ;;  %v1869_v8 = vld [vmem:[%s2470_s2 + $0x68] sm:$0xff]   ;;  %v165_v23 = vunpack.c.l.s4 %v2003_v22  ;;  %vm1533_vm2 = vcmask 41984   ;;  %vm1520_vm3 = vcmask 9224   ;;  %vm1544_vm4 = vcmask 58384  }
   0x2   :  { %v1862_v1 = vld [vmem:[%s2470_s2 + $0xf8] sm:$0xff]   ;;  %1682 = vmatprep.subr.bf16.mxu0 %v1861_v0  ;;  %v1866_v5 = vld [vmem:[%s2470_s2 + $0xf0] sm:$0xff]   ;;  %v1870_v9 = vld [vmem:[%s2470_s2 + $0xe8] sm:$0xff]   ;;  %v168_v30 = vshrl.u32 %v167_v24, 7 }
   0x3   :  { %v1863_v2 = vld [vmem:[%s2470_s2 + $0x38] sm:$0xff]   ;;  %1704 = vmatprep.subr.bf16.mxu1 %v1862_v1  ;;  %v1867_v6 = vld [vmem:[%s2470_s2 + $0x30] sm:$0xff]   ;;  %v1871_v10 = vld [vmem:[%s2470_s2 + $0x28] sm:$0xff]   ;;  %v166_v29 = vunpack.c.0.s8 %v165_v23 }
   0x4   :  { %v1864_v3 = vld [vmem:[%s2470_s2 + $0xb8] sm:$0xff]   ;;  %1683 = vmatpush3.bf16.msra.mxu0 %v1863_v2  ;;  %v1868_v7 = vld [vmem:[%s2470_s2 + $0xb0] sm:$0xff]   ;;  %v1872_v11 = vld [vmem:[%s2470_s2 + $0xa8] sm:$0xff]  }
   0x5   :  { %1705 = vmatpush3.bf16.msra.mxu1 %v1864_v3  ;;  %1684 = vmatprep.subr.bf16.mxu0 %v1865_v4  ;;  %v1873_v12 = vld [vmem:[%s2470_s2 + $0x60] sm:$0xff]   ;;  %v1877_v16 = vld [vmem:[%s2470_s2 + $0x58] sm:$0xff]   ;;  %v1881_v20 = vld [vmem:[%s2470_s2 + $0x50] sm:$0xff]   ;;  %v2131_v35 = vsub.s32 %v166_v29, %v168_v30 }
   0x6   :  { %1706 = vmatprep.subr.bf16.mxu1 %v1866_v5  ;;  %v1874_v13 = vld [vmem:[%s2470_s2 + $0xe0] sm:$0xff]   ;;  %v1878_v17 = vld [vmem:[%s2470_s2 + $0xd8] sm:$0xff]   ;;  %v1882_v21 = vld [vmem:[%s2470_s2 + $0xd0] sm:$0xff]  }
   0x7   :  { %v1875_v14 = vld [vmem:[%s2470_s2 + $0x20] sm:$0xff]   ;;  %v1879_v18 = vld [vmem:[%s2470_s2 + $0x18] sm:$0xff]   ;;  %v1883_v25 = vld [vmem:[%s2470_s2 + $0x10] sm:$0xff]  }
   0x8   :  { %1685 = vmatpush3.bf16.msra.mxu0 %v1867_v6  ;;  %v1876_v15 = vld [vmem:[%s2470_s2 + $0xa0] sm:$0xff]   ;;  %v1880_v19 = vld [vmem:[%s2470_s2 + $0x98] sm:$0xff]   ;;  %v1884_v26 = vld [vmem:[%s2470_s2 + $0x90] sm:$0xff]  }
   0x9   :  { %1707 = vmatpush3.bf16.msra.mxu1 %v1868_v7  ;;  %1686 = vmatprep.subr.bf16.mxu0 %v1869_v8  ;;  %v1885_v27 = vld [vmem:[%s2470_s2 + $0x48] sm:$0xff]   ;;  %v1889_v33 = vld [vmem:[%s2470_s2 + $0x40] sm:$0xff]   ;;  %v1894_v41 = vld [vmem:[%s2470_s2 + $0x178] sm:$0xff]  }
   0xa   :  { %1708 = vmatprep.subr.bf16.mxu1 %v1870_v9  ;;  %v1886_v28 = vld [vmem:[%s2470_s2 + $0xc8] sm:$0xff]   ;;  %v1890_v34 = vld [vmem:[%s2470_s2 + $0xc0] sm:$0xff]   ;;  %v1895_v42 = vld [vmem:[%s2470_s2 + $0x1f8] sm:$0xff]  }
   0xb   :  { %v1887_v31 = vld [vmem:[%s2470_s2 + $0x8] sm:$0xff]   ;;  %v1891_v36 = vld [vmem:[%s2470_s2] sm:$0xff]   ;;  %v1896_v47 = vld [vmem:[%s2470_s2 + $0x138] sm:$0xff]  }
   0xc   :  { %1687 = vmatpush3.bf16.msra.mxu0 %v1871_v10  ;;  %v1888_v32 = vld [vmem:[%s2470_s2 + $0x88] sm:$0xff]   ;;  %v1892_v37 = vld [vmem:[%s2470_s2 + $0x80] sm:$0xff]   ;;  %v1898_v50 = vld [vmem:[%s2470_s2 + $0x170] sm:$0xff]  }
   0xd   :  { %1709 = vmatpush3.bf16.msra.mxu1 %v1872_v11  ;;  %1688 = vmatprep.subr.bf16.mxu0 %v1873_v12  ;;  %v26_v38 = vld [vmem:[%s2471_s0] sm:$0xff]  ;;  %v1897_v52 = vld [vmem:[%s2470_s2 + $0x1b8] sm:$0xff]   ;;  %v1899_v54 = vld [vmem:[%s2470_s2 + $0x1f0] sm:$0xff]  }
   0xe   :  { %1710 = vmatprep.subr.bf16.mxu1 %v1874_v13  ;;  %v163_v39 = vcombine.high %v26_v38, %v26_v38  ;;  %v170_v40 = vrot.slane %v26_v38, %v2131_v35  ;;  %v1900_v55 = vld [vmem:[%s2470_s2 + $0x130] sm:$0xff]   ;;  %v1902_v57 = vld [vmem:[%s2470_s2 + $0x168] sm:$0xff]   ;;  %v1906_v61 = vld [vmem:[%s2470_s2 + $0x160] sm:$0xff]  }
   0xf   :  { %v1901_v58 = vld [vmem:[%s2470_s2 + $0x1b0] sm:$0xff]   ;;  %v1903_v59 = vld [vmem:[%s2470_s2 + $0x1e8] sm:$0xff]   ;;  %v1907_v63 = vld [vmem:[%s2470_s2 + $0x1e0] sm:$0xff]  }
  0x10   :  { %1689 = vmatpush3.bf16.msra.mxu0 %v1875_v14  ;;  %v178_v43 = vcombine.high %v170_v40, %v170_v40  ;;  %v186_v44 = vrot.slane %v170_v40, %v2131_v35  ;;  %v2151_v45 = vrot.slane %v163_v39, %v2131_v35  ;;  %v1904_v60 = vld [vmem:[%s2470_s2 + $0x128] sm:$0xff]   ;;  %v1908_v0 = vld [vmem:[%s2470_s2 + $0x120] sm:$0xff]   ;;  %v1910_v1 = vld [vmem:[%s2470_s2 + $0x158] sm:$0xff]  }
  0x11   :  { %1711 = vmatpush3.bf16.msra.mxu1 %v1876_v15  ;;  %1690 = vmatprep.subr.bf16.mxu0 %v1877_v16  ;;  %v1905_v62 = vld [vmem:[%s2470_s2 + $0x1a8] sm:$0xff]   ;;  %v1909_v2 = vld [vmem:[%s2470_s2 + $0x1a0] sm:$0xff]   ;;  %v1911_v3 = vld [vmem:[%s2470_s2 + $0x1d8] sm:$0xff]  }
  0x12   :  { %1712 = vmatprep.subr.bf16.mxu1 %v1878_v17  ;;  %v200_v46 = vrot.slane %v178_v43, %v2131_v35  ;;  %v179_v48 = vcombine.high %v2151_v45, %v2151_v45  ;;  %v208_v49 = vcombine.high %v186_v44, %v186_v44  ;;  %v1912_v4 = vld [vmem:[%s2470_s2 + $0x118] sm:$0xff]   ;;  %v1914_v5 = vld [vmem:[%s2470_s2 + $0x150] sm:$0xff]   ;;  %v1918_v9 = vld [vmem:[%s2470_s2 + $0x148] sm:$0xff]   ;;  %v193_v17 = vrot.slane %v2151_v45, %v2131_v35 }
  0x13   :  { %v1913_v6 = vld [vmem:[%s2470_s2 + $0x198] sm:$0xff]   ;;  %v1915_v7 = vld [vmem:[%s2470_s2 + $0x1d0] sm:$0xff]   ;;  %v1919_v11 = vld [vmem:[%s2470_s2 + $0x1c8] sm:$0xff]  }
  0x14   :  { %1691 = vmatpush3.bf16.msra.mxu0 %v1879_v18  ;;  %636 = vmatprep.mubr.bf16.mxu0 %v200_v46  ;;  %v210_v51 = vcombine.high %v200_v46, %v200_v46  ;;  %v207_v53 = vrot.slane %v179_v48, %v2131_v35  ;;  %v1916_v8 = vld [vmem:[%s2470_s2 + $0x110] sm:$0xff]   ;;  %v1920_v12 = vld [vmem:[%s2470_s2 + $0x108] sm:$0xff]   ;;  %v1922_v13 = vld [vmem:[%s2470_s2 + $0x140] sm:$0xff]   ;;  %v209_v22 = vcombine.high %v193_v17, %v193_v17 }
  0x15   :  { %1713 = vmatpush3.bf16.msra.mxu1 %v1880_v19  ;;  %1692 = vmatprep.subr.bf16.mxu0 %v1881_v20  ;;  %v1917_v10 = vld [vmem:[%s2470_s2 + $0x190] sm:$0xff]   ;;  %v1921_v14 = vld [vmem:[%s2470_s2 + $0x188] sm:$0xff]   ;;  %v1923_v15 = vld [vmem:[%s2470_s2 + $0x1c0] sm:$0xff]  }
  0x16   :  { %1714 = vmatprep.subr.bf16.mxu1 %v1882_v21  ;;  %676 = vmatprep.mubr.bf16.mxu1 %v210_v51  ;;  %v211_v56 = vcombine.high %v207_v53, %v207_v53  ;;  %v1924_v16 = vld [vmem:[%s2470_s2 + $0x100] sm:$0xff]   ;;  %v1926_v18 = vld [vmem:[%s2472_s3 + $0x78] sm:$0xff]   ;;  %v1930_v23 = vld [vmem:[%s2472_s3 + $0x70] sm:$0xff]  }
  0x17   :  { %v1925_v19 = vld [vmem:[%s2470_s2 + $0x180] sm:$0xff]   ;;  %v1927_v20 = vld [vmem:[%s2472_s3 + $0xf8] sm:$0xff]   ;;  %v1935_v29 = vld [vmem:[%s2472_s3 + $0xe8] sm:$0xff]  }
  0x18   :  { %1693 = vmatpush3.bf16.msra.mxu0 %v1883_v25  ;;  %v1928_v21 = vld [vmem:[%s2472_s3 + $0x38] sm:$0xff]   ;;  %v1931_v25 = vld [vmem:[%s2472_s3 + $0xf0] sm:$0xff]   ;;  %v1936_v30 = vld [vmem:[%s2472_s3 + $0x28] sm:$0xff]  }
  0x19   :  { %1715 = vmatpush3.bf16.msra.mxu1 %v1884_v26  ;;  %1694 = vmatprep.subr.bf16.mxu0 %v1885_v27  ;;  %v1929_v24 = vld [vmem:[%s2472_s3 + $0xb8] sm:$0xff]   ;;  %v1932_v26 = vld [vmem:[%s2472_s3 + $0x30] sm:$0xff]   ;;  %v1934_v27 = vld [vmem:[%s2472_s3 + $0x68] sm:$0xff]  }
  0x1a   :  { %1716 = vmatprep.subr.bf16.mxu1 %v1886_v28  ;;  %v1933_v28 = vld [vmem:[%s2472_s3 + $0xb0] sm:$0xff]   ;;  %v1943_v38 = vld [vmem:[%s2472_s3 + $0xd8] sm:$0xff]   ;;  %v1951_v46 = vld [vmem:[%s2472_s3 + $0xc8] sm:$0xff]  }
  0x1b   :  { %v1944_v39 = vld [vmem:[%s2472_s3 + $0x18] sm:$0xff]   ;;  %v1946_v40 = vld [vmem:[%s2472_s3 + $0x50] sm:$0xff]   ;;  %v1954_v48 = vld [vmem:[%s2472_s3 + $0x40] sm:$0xff]  }
  0x1c   :  { %1695 = vmatpush3.bf16.msra.mxu0 %v1887_v31  ;;  %v1938_v31 = vld [vmem:[%s2472_s3 + $0x60] sm:$0xff]   ;;  %v1948_v43 = vld [vmem:[%s2472_s3 + $0x10] sm:$0xff]  }
  0x1d   :  { %1717 = vmatpush3.bf16.msra.mxu1 %v1888_v32  ;;  %1696 = vmatprep.subr.bf16.mxu0 %v1889_v33  ;;  %v1937_v32 = vld [vmem:[%s2472_s3 + $0xa8] sm:$0xff]   ;;  %v1939_v33 = vld [vmem:[%s2472_s3 + $0xe0] sm:$0xff]   ;;  %v1949_v45 = vld [vmem:[%s2472_s3 + $0x90] sm:$0xff]  }
  0x1e   :  { %1718 = vmatprep.subr.bf16.mxu1 %v1890_v34  ;;  %v1940_v34 = vld [vmem:[%s2472_s3 + $0x20] sm:$0xff]  }
  0x1f   :  { %v764_v51 = vld [vmem:[%s2473_s1] sm:$0xff] }
  0x20   :  { %1697 = vmatpush3.bf16.msra.mxu0 %v1891_v36  ;;  %v1942_v36 = vld [vmem:[%s2472_s3 + $0x58] sm:$0xff]  }
  0x21   :  { %1719 = vmatpush3.bf16.msra.mxu1 %v1892_v37  ;;  %1726 = vmatprep.subr.bf16.mxu0 %v1894_v41  ;;  %v1941_v37 = vld [vmem:[%s2472_s3 + $0xa0] sm:$0xff]   ;;  %v1945_v41 = vld [vmem:[%s2472_s3 + $0x98] sm:$0xff]  }
  0x22   :  { %1748 = vmatprep.subr.bf16.mxu1 %v1895_v42  ;;  %v1947_v42 = vld [vmem:[%s2472_s3 + $0xd0] sm:$0xff]  }
  0x23   :  { %637 = vmatmul.mubr.bf16.vlgmr.msra.gmra.mxu0 %v186_v44  ;;  %v1950_v44 = vld [vmem:[%s2472_s3 + $0x48] sm:$0xff]  }
  0x24   :  { %1727 = vmatpush3.bf16.msra.mxu0 %v1896_v47  ;;  %677 = vmatmul.mubr.bf16.vlgmr.msra.gmra.mxu1 %v208_v49  ;;  %v1952_v47 = vld [vmem:[%s2472_s3 + $0x8] sm:$0xff]  }
  0x25   :  { %1728 = vmatprep.subr.bf16.mxu0 %v1898_v50  ;;  %1749 = vmatpush3.bf16.msra.mxu1 %v1897_v52  ;;  %v1953_v49 = vld [vmem:[%s2472_s3 + $0x88] sm:$0xff]   ;;  %v1955_v50 = vld [vmem:[%s2472_s3 + $0xc0] sm:$0xff]  }
  0x26   :  { %716 = vmatprep.mubr.bf16.mxu0 %v207_v53  ;;  %1750 = vmatprep.subr.bf16.mxu1 %v1899_v54  ;;  %v1956_v52 = vld [vmem:[%s2472_s3] sm:$0xff]   ;;  %v908_v53 = vrot.slane %v764_v51, %v2131_v35  ;;  %v901_v54 = vcombine.high %v764_v51, %v764_v51 }
  0x27   :  { %756 = vmatprep.mubr.bf16.mxu1 %v211_v56  ;;  %v1957_v56 = vld [vmem:[%s2472_s3 + $0x80] sm:$0xff]  }
  0x28   :  { %1729 = vmatpush3.bf16.msra.mxu0 %v1900_v55  ;;  %v1958_v55 = vld [vmem:[%s2472_s3 + $0x178] sm:$0xff]  }
  0x29   :  { %1730 = vmatprep.subr.bf16.mxu0 %v1902_v57  ;;  %1751 = vmatpush3.bf16.msra.mxu1 %v1901_v58  ;;  %v916_v57 = vcombine.high %v908_v53, %v908_v53  ;;  %v924_v58 = vrot.slane %v908_v53, %v2131_v35 }
  0x2a   :  { %1752 = vmatprep.subr.bf16.mxu1 %v1903_v59  ;;  %v2354_v59 = vrot.slane %v901_v54, %v2131_v35 }
  0x2c   :  { %1731 = vmatpush3.bf16.msra.mxu0 %v1904_v60  ;;  %v1959_v60 = vld [vmem:[%s2472_s3 + $0x1f8] sm:$0xff]  }
  0x2d   :  { %1732 = vmatprep.subr.bf16.mxu0 %v1906_v61  ;;  %1753 = vmatpush3.bf16.msra.mxu1 %v1905_v62  ;;  %v938_v61 = vrot.slane %v916_v57, %v2131_v35  ;;  %v1960_v62 = vld [vmem:[%s2472_s3 + $0x138] sm:$0xff]  }
  0x2e   :  { %1754 = vmatprep.subr.bf16.mxu1 %v1907_v63  ;;  %v917_v63 = vcombine.high %v2354_v59, %v2354_v59 }
  0x30   :  { %1733 = vmatpush3.bf16.msra.mxu0 %v1908_v0  ;;  %v946_v0 = vcombine.high %v924_v58, %v924_v58 }
  0x31   :  { %1734 = vmatprep.subr.bf16.mxu0 %v1910_v1  ;;  %1755 = vmatpush3.bf16.msra.mxu1 %v1909_v2  ;;  %v1962_v1 = vld [vmem:[%s2472_s3 + $0x170] sm:$0xff]   ;;  %v11_v2 = vstv %s2474_s4 }
  0x32   :  { %1756 = vmatprep.subr.bf16.mxu1 %v1911_v3  ;;  %v948_v3 = vcombine.high %v938_v61, %v938_v61  ;;  %12 = vst [vmem:[#allocation2] sm:$0x1] %v11_v2 }
  0x34   :  { %1735 = vmatpush3.bf16.msra.mxu0 %v1912_v4  ;;  %v1961_v4 = vld [vmem:[%s2472_s3 + $0x1b8] sm:$0xff]  }
  0x35   :  { %1736 = vmatprep.subr.bf16.mxu0 %v1914_v5  ;;  %1757 = vmatpush3.bf16.msra.mxu1 %v1913_v6  ;;  %v945_v5 = vrot.slane %v917_v63, %v2131_v35  ;;  %v1963_v6 = vld [vmem:[%s2472_s3 + $0x1f0] sm:$0xff]  }
  0x36   :  { %1758 = vmatprep.subr.bf16.mxu1 %v1915_v7  ;;  %v1964_v7 = vld [vmem:[%s2472_s3 + $0x130] sm:$0xff]  }
  0x38   :  { %1737 = vmatpush3.bf16.msra.mxu0 %v1916_v8  ;;  %v949_v8 = vcombine.high %v945_v5, %v945_v5 }
  0x39   :  { %1738 = vmatprep.subr.bf16.mxu0 %v1918_v9  ;;  %1759 = vmatpush3.bf16.msra.mxu1 %v1917_v10  ;;  %v1966_v9 = vld [vmem:[%s2472_s3 + $0x168] sm:$0xff]   ;;  %v1965_v10 = vld [vmem:[%s2472_s3 + $0x1b0] sm:$0xff]  }
  0x3a   :  { %1760 = vmatprep.subr.bf16.mxu1 %v1919_v11  ;;  %v1967_v11 = vld [vmem:[%s2472_s3 + $0x1e8] sm:$0xff]  }
  0x3c   :  { %1739 = vmatpush3.bf16.msra.mxu0 %v1920_v12  ;;  %v1968_v12 = vld [vmem:[%s2472_s3 + $0x128] sm:$0xff]  }
  0x3d   :  { %1740 = vmatprep.subr.bf16.mxu0 %v1922_v13  ;;  %1761 = vmatpush3.bf16.msra.mxu1 %v1921_v14  ;;  %v1970_v13 = vld [vmem:[%s2472_s3 + $0x160] sm:$0xff]   ;;  %v1969_v14 = vld [vmem:[%s2472_s3 + $0x1a8] sm:$0xff]  }
  0x3e   :  { %1762 = vmatprep.subr.bf16.mxu1 %v1923_v15  ;;  %v1971_v15 = vld [vmem:[%s2472_s3 + $0x1e0] sm:$0xff]  }
  0x40   :  { %1741 = vmatpush3.bf16.msra.mxu0 %v1924_v16  ;;  %v1972_v16 = vld [vmem:[%s2472_s3 + $0x120] sm:$0xff]  }
  0x41   :  { %1770 = vmatprep.subr.bf16.mxu0 %v1926_v18  ;;  %1763 = vmatpush3.bf16.msra.mxu1 %v1925_v19  ;;  %v1973_v18 = vld [vmem:[%s2472_s3 + $0x1a0] sm:$0xff]   ;;  %v1975_v19 = vld [vmem:[%s2472_s3 + $0x1d8] sm:$0xff]  }
  0x42   :  { %1792 = vmatprep.subr.bf16.mxu1 %v1927_v20  ;;  %v1976_v20 = vld [vmem:[%s2472_s3 + $0x118] sm:$0xff]  }
  0x43   :  { %717 = vmatmul.mubr.bf16.vlgmr.msra.gmra.mxu0 %v193_v17  ;;  %v1974_v17 = vld [vmem:[%s2472_s3 + $0x158] sm:$0xff]  }
  0x44   :  { %1771 = vmatpush3.bf16.msra.mxu0 %v1928_v21  ;;  %757 = vmatmul.mubr.bf16.vlgmr.msra.gmra.mxu1 %v209_v22  ;;  %v1978_v21 = vld [vmem:[%s2472_s3 + $0x150] sm:$0xff]   ;;  %v1977_v22 = vld [vmem:[%s2472_s3 + $0x198] sm:$0xff]  }
  0x45   :  { %1772 = vmatprep.subr.bf16.mxu0 %v1930_v23  ;;  %1793 = vmatpush3.bf16.msra.mxu1 %v1929_v24  ;;  %v1979_v23 = vld [vmem:[%s2472_s3 + $0x1d0] sm:$0xff]  }
  0x46   :  { %1794 = vmatprep.subr.bf16.mxu1 %v1931_v25  ;;  %1374 = vmatprep.mubr.bf16.mxu0 %v938_v61  ;;  %v1980_v24 = vld [vmem:[%s2472_s3 + $0x110] sm:$0xff]   ;;  %v1982_v25 = vld [vmem:[%s2472_s3 + $0x148] sm:$0xff]  }
  0x47   :  { %1414 = vmatprep.mubr.bf16.mxu1 %v948_v3 }
  0x48   :  { %1773 = vmatpush3.bf16.msra.mxu0 %v1932_v26  ;;  %v1981_v26 = vld [vmem:[%s2472_s3 + $0x190] sm:$0xff]  }
  0x49   :  { %1774 = vmatprep.subr.bf16.mxu0 %v1934_v27  ;;  %1795 = vmatpush3.bf16.msra.mxu1 %v1933_v28  ;;  %v1983_v27 = vld [vmem:[%s2472_s3 + $0x1c8] sm:$0xff]  }
  0x4a   :  { %1796 = vmatprep.subr.bf16.mxu1 %v1935_v29  ;;  %v1984_v28 = vld [vmem:[%s2472_s3 + $0x108] sm:$0xff]   ;;  %v1986_v29 = vld [vmem:[%s2472_s3 + $0x140] sm:$0xff]  }
  0x4c   :  { %1775 = vmatpush3.bf16.msra.mxu0 %v1936_v30  ;;  %v1985_v30 = vld [vmem:[%s2472_s3 + $0x188] sm:$0xff]  }
  0x4d   :  { %1776 = vmatprep.subr.bf16.mxu0 %v1938_v31  ;;  %1797 = vmatpush3.bf16.msra.mxu1 %v1937_v32  ;;  %v1987_v31 = vld [vmem:[%s2472_s3 + $0x1c0] sm:$0xff]  }
  0x4e   :  { %1798 = vmatprep.subr.bf16.mxu1 %v1939_v33  ;;  %v1988_v32 = vld [vmem:[%s2472_s3 + $0x100] sm:$0xff]   ;;  %v931_v33 = vrot.slane %v2354_v59, %v2131_v35 }
  0x50   :  { %1777 = vmatpush3.bf16.msra.mxu0 %v1940_v34  ;;  %v1989_v34 = vld [vmem:[%s2472_s3 + $0x180] sm:$0xff]  }
  0x51   :  { %1778 = vmatprep.subr.bf16.mxu0 %v1942_v36  ;;  %1799 = vmatpush3.bf16.msra.mxu1 %v1941_v37  ;;  %v947_v36 = vcombine.high %v931_v33, %v931_v33 }
  0x52   :  { %1800 = vmatprep.subr.bf16.mxu1 %v1943_v38 }
  0x54   :  { %1779 = vmatpush3.bf16.msra.mxu0 %v1944_v39 }
  0x55   :  { %1780 = vmatprep.subr.bf16.mxu0 %v1946_v40  ;;  %1801 = vmatpush3.bf16.msra.mxu1 %v1945_v41 }
  0x56   :  { %1802 = vmatprep.subr.bf16.mxu1 %v1947_v42 }
  0x58   :  { %1781 = vmatpush3.bf16.msra.mxu0 %v1948_v43 }
  0x59   :  { %1782 = vmatprep.subr.bf16.mxu0 %v1950_v44  ;;  %1803 = vmatpush3.bf16.msra.mxu1 %v1949_v45  ;;  %v1550_v45 = vld [vmem:[#allocation2] ss:$0 sm:$0xff] }
  0x5a   :  { %1804 = vmatprep.subr.bf16.mxu1 %v1951_v46 }
  0x5c   :  { %1783 = vmatpush3.bf16.msra.mxu0 %v1952_v47 }
  0x5d   :  { %1784 = vmatprep.subr.bf16.mxu0 %v1954_v48  ;;  %1805 = vmatpush3.bf16.msra.mxu1 %v1953_v49 }
  0x5e   :  { %1806 = vmatprep.subr.bf16.mxu1 %v1955_v50 }
  0x60   :  { %1785 = vmatpush3.bf16.msra.mxu0 %v1956_v52 }
  0x61   :  { %1814 = vmatprep.subr.bf16.mxu0 %v1958_v55  ;;  %1807 = vmatpush3.bf16.msra.mxu1 %v1957_v56 }
  0x62   :  { %1836 = vmatprep.subr.bf16.mxu1 %v1959_v60 }
  0x63   :  { %1375 = vmatmul.mubr.bf16.vlgmr.msra.gmra.mxu0 %v924_v58 }
  0x64   :  { %1815 = vmatpush3.bf16.msra.mxu0 %v1960_v62  ;;  %1415 = vmatmul.mubr.bf16.vlgmr.msra.gmra.mxu1 %v946_v0 }
  0x65   :  { %1816 = vmatprep.subr.bf16.mxu0 %v1962_v1  ;;  %1837 = vmatpush3.bf16.msra.mxu1 %v1961_v4 }
  0x66   :  { %1454 = vmatprep.mubr.bf16.mxu0 %v945_v5  ;;  %1838 = vmatprep.subr.bf16.mxu1 %v1963_v6 }
  0x67   :  { %1494 = vmatprep.mubr.bf16.mxu1 %v949_v8 }
  0x68   :  { %1817 = vmatpush3.bf16.msra.mxu0 %v1964_v7 }
  0x69   :  { %1818 = vmatprep.subr.bf16.mxu0 %v1966_v9  ;;  %1839 = vmatpush3.bf16.msra.mxu1 %v1965_v10  ;;  %v1615_v10 = vld [vmem:[%s2476_s5] ss:$0 sm:$0xff]  ;;  %s2004_s5 = smov 127  }
  0x6a   :  { %1840 = vmatprep.subr.bf16.mxu1 %v1967_v11 }
  0x6c   :  { %1819 = vmatpush3.bf16.msra.mxu0 %v1968_v12 }
  0x6d   :  { %1820 = vmatprep.subr.bf16.mxu0 %v1970_v13  ;;  %1841 = vmatpush3.bf16.msra.mxu1 %v1969_v14 }
  0x6e   :  { %1842 = vmatprep.subr.bf16.mxu1 %v1971_v15 }
  0x70   :  { %1821 = vmatpush3.bf16.msra.mxu0 %v1972_v16 }
  0x71   :  { %1822 = vmatprep.subr.bf16.mxu0 %v1974_v17  ;;  %1843 = vmatpush3.bf16.msra.mxu1 %v1973_v18 }
  0x72   :  { %1844 = vmatprep.subr.bf16.mxu1 %v1975_v19 }
  0x74   :  { %1823 = vmatpush3.bf16.msra.mxu0 %v1976_v20 }
  0x75   :  { %1824 = vmatprep.subr.bf16.mxu0 %v1978_v21  ;;  %1845 = vmatpush3.bf16.msra.mxu1 %v1977_v22 }
  0x76   :  { %1846 = vmatprep.subr.bf16.mxu1 %v1979_v23 }
  0x78   :  { %1825 = vmatpush3.bf16.msra.mxu0 %v1980_v24 }
  0x79   :  { %1826 = vmatprep.subr.bf16.mxu0 %v1982_v25  ;;  %1847 = vmatpush3.bf16.msra.mxu1 %v1981_v26 }
  0x7a   :  { %1848 = vmatprep.subr.bf16.mxu1 %v1983_v27 }
  0x7c   :  { %1827 = vmatpush3.bf16.msra.mxu0 %v1984_v28 }
  0x7d   :  { %1828 = vmatprep.subr.bf16.mxu0 %v1986_v29  ;;  %1849 = vmatpush3.bf16.msra.mxu1 %v1985_v30 }
  0x7e   :  { %1850 = vmatprep.subr.bf16.mxu1 %v1987_v31 }
  0x80   :  { %1829 = vmatpush3.bf16.msra.mxu0 %v1988_v32 }
  0x81   :  { %1851 = vmatpush3.bf16.msra.mxu1 %v1989_v34 }
  0x83   :  { %1455 = vmatmul.mubr.bf16.vlgmr.msra.gmra.mxu0 %v931_v33 }
  0x84   :  { %1495 = vmatmul.mubr.bf16.vlgmr.msra.gmra.mxu1 %v947_v36 }
  0xe3   :  { %v1698_v37 = vpop.f32.mrf.mxu0 }
  0xe4   :  { %v1720_v38 = vpop.f32.mrf.mxu1 }
  0xe5   :  { %v1699_v39 = vpop.f32.mrf.mxu0 }
  0xe6   :  { %v1721_v40 = vpop.f32.mrf.mxu1  ;;  %v1700_v35 = vadd.f32 %v1699_v39, %v1698_v37 }
  0xe7   :  { %v1701_v41 = vpop.f32.mrf.mxu0  ;;  %v1722_v47 = vadd.f32 %v1721_v40, %v1720_v38 }
  0xe8   :  { %v1723_v42 = vpop.f32.mrf.mxu1  ;;  %v639_v46 = vadd.f32 %v1700_v35, %v1550_v45 }
  0xe9   :  { %v1702_v43 = vpop.f32.mrf.mxu0 }
  0xea   :  { %v1724_v44 = vpop.f32.mrf.mxu1  ;;  %v679_v51 = vadd.f32 %v1722_v47, %v639_v46 }
 0x103   :  { %v1742_v48 = vpop.f32.mrf.mxu0 }
 0x104   :  { %v1764_v49 = vpop.f32.mrf.mxu1 }
 0x105   :  { %v1743_v50 = vpop.f32.mrf.mxu0 }
 0x106   :  { %v1744_v52 = vadd.f32 %v1743_v50, %v1742_v48  ;;  %v1765_v53 = vpop.f32.mrf.mxu1 }
 0x107   :  { %v1745_v54 = vpop.f32.mrf.mxu0  ;;  %v1766_v56 = vadd.f32 %v1765_v53, %v1764_v49 }
 0x108   :  { %v719_v55 = vadd.f32 %v1744_v52, %v679_v51  ;;  %v1767_v57 = vpop.f32.mrf.mxu1 }
 0x109   :  { %v1746_v58 = vpop.f32.mrf.mxu0 }
 0x10a   :  { %v759_v59 = vadd.f32 %v1766_v56, %v719_v55  ;;  %v1768_v60 = vpop.f32.mrf.mxu1 }
 0x10c   :  { %v1680_v61 = vmul.f32 -1.442695, %v759_v59 }
 0x10e   :  { %1991 = vpow2.f32 %v1680_v61 }
 0x11b   :  { %v1992_v62 = vpop.eup %1991 }
 0x11c   :  { %v1505_v63 = vadd.f32 1.0, %v1992_v62 }
 0x11e   :  { %1993 = vrcp.f32 %v1505_v63 }
 0x123   :  { %v1786_v0 = vpop.f32.mrf.mxu0 }
 0x124   :  { %v1808_v1 = vpop.f32.mrf.mxu1 }
 0x125   :  { %v1787_v2 = vpop.f32.mrf.mxu0 }
 0x126   :  { %v1809_v3 = vpop.f32.mrf.mxu1  ;;  %v1788_v9 = vadd.f32 %v1787_v2, %v1786_v0 }
 0x127   :  { %v1789_v4 = vpop.f32.mrf.mxu0  ;;  %v1810_v12 = vadd.f32 %v1809_v3, %v1808_v1 }
 0x128   :  { %v1811_v5 = vpop.f32.mrf.mxu1  ;;  %v1377_v11 = vadd.f32 %v1788_v9, %v1615_v10 }
 0x129   :  { %v1790_v6 = vpop.f32.mrf.mxu0 }
 0x12a   :  { %v1812_v8 = vpop.f32.mrf.mxu1  ;;  %v1417_v16 = vadd.f32 %v1810_v12, %v1377_v11 }
 0x12b   :  { %v1994_v7 = vpop.eup %1993 }
 0x12c   :  { %1509 = vst.msk [vmem:[%s2475_s6] sm:$0x3] %vm1508_vm0, %v1994_v7 }
 0x143   :  { %v1830_v13 = vpop.f32.mrf.mxu0 }
 0x144   :  { %v1852_v14 = vpop.f32.mrf.mxu1 }
 0x145   :  { %v1831_v15 = vpop.f32.mrf.mxu0 }
 0x146   :  { %v1832_v17 = vadd.f32 %v1831_v15, %v1830_v13  ;;  %v1853_v18 = vpop.f32.mrf.mxu1 }
 0x147   :  { %v1833_v19 = vpop.f32.mrf.mxu0  ;;  %v1854_v21 = vadd.f32 %v1853_v18, %v1852_v14 }
 0x148   :  { %v1457_v20 = vadd.f32 %v1832_v17, %v1417_v16  ;;  %v1855_v22 = vpop.f32.mrf.mxu1 }
 0x149   :  { %v1834_v23 = vpop.f32.mrf.mxu0 }
 0x14a   :  { %v1497_v24 = vadd.f32 %v1854_v21, %v1457_v20  ;;  %v1856_v25 = vpop.f32.mrf.mxu1 }
 0x14c   :  { %v1523_v26 = vsel %vm1522_vm1, %v1497_v24, -inf  ;;  %v1681_v31 = vmul.f32 -1.442695, %v1497_v24 }
 0x14d   :  { %1524 = vmax.xlane.f32.xlu0 %v1523_v26 }
 0x1d6   :  { %v1525_v27 = vpop.xlane.xlu0 %1524 }
 0x1d7   :  { %v1526_v28 = vsub.f32 %v1497_v24, %v1525_v27 }
 0x1d9   :  { %v1527_v29 = vmul.f32 1.442695, %v1526_v28 }
 0x1db   :  { %1995 = vpow2.f32 %v1527_v29 }
 0x1dc   :  { %1997 = vpow2.f32 %v1681_v31 }
 0x1e8   :  { %v1996_v30 = vpop.eup %1995 }
 0x1e9   :  { %1530 = vrot.lane.b32.xlu0 %v1996_v30, %s2004_s5  ;;  %v1998_v32 = vpop.eup %1997 }
 0x1ea   :  { %v1513_v34 = vadd.f32 1.0, %v1998_v32 }
 0x1ec   :  { %1999 = vrcp.f32 %v1513_v34 }
 0x1f9   :  { %v2000_v37 = vpop.eup %1999 }
 0x25b   :  { %v1531_v33 = vpop.permute.xlu0 %1530 }
 0x25c   :  { %v1534_v36 = vsel %vm1533_vm2, %v1531_v33, 0.0 }
 0x25d   :  { %1535 = vadd.xlane.f32.xlu1 %v1534_v36 }
 0x26e   :  { %1517 = vrot.lane.b32.xlu1 %v2000_v37, %s2005_s28 }
 0x2e6   :  { %v1536_v38 = vpop.xlane.xlu1 %1535 }
 0x2e7   :  { %2001 = vlog2.f32 %v1536_v38 }
 0x2ea   :  { %v1518_v39 = vpop.permute.xlu1 %1517 }
 0x2eb   :  { %1521 = vst.msk [vmem:[%s2475_s6] sm:$0x3] %vm1520_vm3, %v1518_v39 }
 0x2f4   :  { %v2002_v40 = vpop.eup %2001 }
 0x2f5   :  { %v1538_v41 = vmul.f32 0.6931472, %v2002_v40 }
 0x2f7   :  { %v1539_v42 = vsub.f32 %v1526_v28, %v1538_v41 }
 0x2f9   :  { %1541 = vrot.lane.b32.xlu1 %v1539_v42, %s2005_s28 }
 0x36b   :  { %v1542_v43 = vpop.permute.xlu1 %1541 }
 0x36c   :  { %1545 = vst.msk [vmem:[%s2475_s6] sm:$0x3] %vm1544_vm4, %v1542_v43 }

</bundles_post_ra>
